<compile_context>
chip_gen: v5e
topology: v5e:2x2
jax: 0.10.0
libtpu: 0.0.40
codegen_flags: <defaults>
</compile_context>

<pallas_src>
import jax
import jax.numpy as jnp
from jax.experimental import pallas as pl
from jax.experimental.pallas import tpu as pltpu


def _round_up(x, m):
    return (x + m - 1) // m * m


def _vmem_limit_bytes():
    # Half of physical VMEM, capped at 64 MiB:
    #   v5e/v6e: 128 MiB physical -> 64 MiB ; v7x: 64 MiB physical -> 32 MiB.
    try:
        cap = pltpu.get_tpu_info().vmem_capacity_bytes
        return int(min(cap // 2, 64 << 20))
    except Exception:
        return 32 << 20  # safe default on every generation


def _mlp_kernel(x_ref, w1_ref, b1_ref, w2_ref, b2_ref, w3_ref, b3_ref, o_ref, h1_acc):
    # Grid: (batch_tiles [parallel], k_tiles [arbitrary/reduction]).
    # x_ref:  (TB, TK) bf16      w1_ref: (TK, H) bf16      b1_ref: (1, H) f32
    # w2_ref: (H, H)  bf16       b2_ref: (1, H) f32
    # w3_ref: (H, Cp) bf16       b3_ref: (1, Cp) f32
    # o_ref:  (TB, Cp) f32       h1_acc: (TB, H) f32 scratch
    k = pl.program_id(1)

    @pl.when(k == 0)
    def _():
        h1_acc[...] = jnp.zeros_like(h1_acc)

    # Layer-1 partial product for this K tile (bf16 x bf16 -> f32 accumulate on MXU).
    h1_acc[...] += jnp.dot(x_ref[...], w1_ref[...], preferred_element_type=jnp.float32)

    @pl.when(k == pl.num_programs(1) - 1)
    def _():
        # Read biases once into locals (avoid re-materialized broadcasts).
        b1 = b1_ref[...]
        b2 = b2_ref[...]
        b3 = b3_ref[...]

        # Layer 1 bias + ReLU, then layers 2 & 3 (weights are already resident).
        h1 = jnp.maximum(h1_acc[...] + b1, 0.0).astype(jnp.bfloat16)
        h2 = jnp.dot(h1, w2_ref[...], preferred_element_type=jnp.float32) + b2
        h2 = jnp.maximum(h2, 0.0).astype(jnp.bfloat16)
        out = jnp.dot(h2, w3_ref[...], preferred_element_type=jnp.float32) + b3
        o_ref[...] = out.astype(o_ref.dtype)


def image_classifier_forward(x_nchw, params):
    """MLP forward pass (logits, pre-softmax) in a single batch/K-tiled Pallas kernel.

    x_nchw: (B, C, H, W) float32
    params: dict with w1 (P,H), b1 (1,H), w2 (H,H), b2 (1,H), w3 (H,Cout), b3 (1,Cout)
    returns: (B, Cout) float32 logits
    """
    B = x_nchw.shape[0]
    # nn.Flatten(): flatten all dims except batch (row-major, matches PyTorch).
    x = x_nchw.reshape(B, -1).astype(jnp.float32)
    P = x.shape[1]

    w1, b1 = params["w1"], params["b1"]
    w2, b2 = params["w2"], params["b2"]
    w3, b3 = params["w3"], params["b3"]
    H = w1.shape[1]
    C_out = w3.shape[1]

    # --- Tiling choices (MXU / lane friendly) --------------------------------
    TILE_B = min(256, _round_up(B, 16))    # >=16 rows (bf16 sublane pack), up to 256
    TILE_K = min(512, _round_up(P, 128))   # K tile for the layer-1 reduction
    B_pad = _round_up(B, TILE_B)
    P_pad = _round_up(P, TILE_K)
    C_pad = _round_up(C_out, 128)          # lane-dense output slab

    # --- Pad + cast operands (bf16 operands, f32 biases/accumulation) --------
    xb = jnp.pad(x, ((0, B_pad - B), (0, P_pad - P))).astype(jnp.bfloat16)
    w1b = jnp.pad(w1, ((0, P_pad - P), (0, 0))).astype(jnp.bfloat16)
    w2b = w2.astype(jnp.bfloat16)
    w3b = jnp.pad(w3, ((0, 0), (0, C_pad - C_out))).astype(jnp.bfloat16)
    b1f = b1.astype(jnp.float32)
    b2f = b2.astype(jnp.float32)
    b3f = jnp.pad(b3, ((0, 0), (0, C_pad - C_out))).astype(jnp.float32)

    grid = (B_pad // TILE_B, P_pad // TILE_K)

    out = pl.pallas_call(
        _mlp_kernel,
        out_shape=jax.ShapeDtypeStruct((B_pad, C_pad), jnp.float32),
        grid_spec=pltpu.PrefetchScalarGridSpec(
            num_scalar_prefetch=0,
            grid=grid,
            in_specs=[
                pl.BlockSpec((TILE_B, TILE_K), lambda i, k: (i, k)),  # x: batch & K tiled
                pl.BlockSpec((TILE_K, H), lambda i, k: (k, 0)),       # w1: K tiled
                pl.BlockSpec((1, H), lambda i, k: (0, 0)),            # b1: resident
                pl.BlockSpec((H, H), lambda i, k: (0, 0)),            # w2: resident
                pl.BlockSpec((1, H), lambda i, k: (0, 0)),            # b2: resident
                pl.BlockSpec((H, C_pad), lambda i, k: (0, 0)),        # w3: resident
                pl.BlockSpec((1, C_pad), lambda i, k: (0, 0)),        # b3: resident
            ],
            out_specs=pl.BlockSpec((TILE_B, C_pad), lambda i, k: (i, 0)),
            scratch_shapes=[pltpu.VMEM((TILE_B, H), jnp.float32)],    # layer-1 accumulator
        ),
        compiler_params=pltpu.CompilerParams(
            dimension_semantics=("parallel", "arbitrary"),
            vmem_limit_bytes=_vmem_limit_bytes(),
        ),
    )(xb, w1b, b1f, w2b, b2f, w3b, b3f)

    # Slice off batch padding and the lane padding of the classifier head.
    return out[:B, :C_out]


def init_params(key, num_pixels, num_hid=512, num_out=10):
    """Deterministic PyTorch-style init: U(-1/sqrt(fan_in), 1/sqrt(fan_in))."""
    k1, k2, k3, k4, k5, k6 = jax.random.split(key, 6)

    def lin(kw, kb, fan_in, fan_out):
        bound = 1.0 / jnp.sqrt(jnp.float32(fan_in))
        w = jax.random.uniform(kw, (fan_in, fan_out), jnp.float32, -bound, bound)
        b = jax.random.uniform(kb, (1, fan_out), jnp.float32, -bound, bound)
        return w, b

    w1, b1 = lin(k1, k2, num_pixels, num_hid)
    w2, b2 = lin(k3, k4, num_hid, num_hid)
    w3, b3 = lin(k5, k6, num_hid, num_out)
    return {"w1": w1, "b1": b1, "w2": w2, "b2": b2, "w3": w3, "b3": b3}


def _reference_forward(x_nchw, params):
    """Pure-JAX reference mirroring the kernel's bf16-operand / f32-accumulate math."""
    x = x_nchw.reshape(x_nchw.shape[0], -1).astype(jnp.bfloat16)
    w1 = params["w1"].astype(jnp.bfloat16)
    w2 = params["w2"].astype(jnp.bfloat16)
    w3 = params["w3"].astype(jnp.bfloat16)
    h1 = jnp.maximum(
        jnp.dot(x, w1, preferred_element_type=jnp.float32) + params["b1"], 0.0
    ).astype(jnp.bfloat16)
    h2 = jnp.maximum(
        jnp.dot(h1, w2, preferred_element_type=jnp.float32) + params["b2"], 0.0
    ).astype(jnp.bfloat16)
    return jnp.dot(h2, w3, preferred_element_type=jnp.float32) + params["b3"]


if __name__ == "__main__":
    key = jax.random.PRNGKey(0)
    kx, kp = jax.random.split(key)

    # Small image batch: (B=2, C=4, H=16, W=16) -> num_pixels = 1024
    B, C, Himg, Wimg = 2, 4, 16, 16
    num_pixels = C * Himg * Wimg
    x = jax.random.normal(kx, (B, C, Himg, Wimg), dtype=jnp.float32)

    params = init_params(kp, num_pixels, num_hid=512, num_out=10)

    logits = jax.block_until_ready(image_classifier_forward(x, params))

    ref = _reference_forward(x, params)
    assert logits.shape == (B, 10)
    assert jnp.allclose(logits, ref, atol=1e-2, rtol=1e-2), float(
        jnp.max(jnp.abs(logits - ref))
    )

    print("KERNEL_OK")
</pallas_src>

<mosaic_0001>
module attributes {stable_mosaic.version = 11 : i64} {
  func.func @_mlp_kernel(%arg0: i32, %arg1: i32, %arg2: memref<16x512xbf16, #tpu.memory_space<vmem>>, %arg3: memref<512x512xbf16, #tpu.memory_space<vmem>>, %arg4: memref<1x512xf32, #tpu.memory_space<vmem>>, %arg5: memref<512x512xbf16, #tpu.memory_space<vmem>>, %arg6: memref<1x512xf32, #tpu.memory_space<vmem>>, %arg7: memref<512x128xbf16, #tpu.memory_space<vmem>>, %arg8: memref<1x128xf32, #tpu.memory_space<vmem>>, %arg9: memref<16x128xf32, #tpu.memory_space<vmem>>, %arg10: memref<16x512xf32, #tpu.memory_space<vmem>>) attributes {dimension_semantics = [#tpu.dimension_semantics<parallel>, #tpu.dimension_semantics<arbitrary>], iteration_bounds = array<i64: 1, 2>, scalar_prefetch = 0 : i64, scratch_operands = 1 : i64, tpu.core_type = #tpu.core_type<tc>, window_params = [{transform_indices = @transform_0, window_bounds = array<i64: 16, 512>}, {transform_indices = @transform_1, window_bounds = array<i64: 512, 512>}, {pipeline_mode = #tpu.pipeline_mode<synchronous>, transform_indices = @transform_2, window_bounds = array<i64: 1, 512>}, {pipeline_mode = #tpu.pipeline_mode<synchronous>, transform_indices = @transform_3, window_bounds = array<i64: 512, 512>}, {pipeline_mode = #tpu.pipeline_mode<synchronous>, transform_indices = @transform_4, window_bounds = array<i64: 1, 512>}, {pipeline_mode = #tpu.pipeline_mode<synchronous>, transform_indices = @transform_5, window_bounds = array<i64: 512, 128>}, {pipeline_mode = #tpu.pipeline_mode<synchronous>, transform_indices = @transform_6, window_bounds = array<i64: 1, 128>}, {transform_indices = @transform_7, window_bounds = array<i64: 16, 128>}]} {
    %c0_i32 = arith.constant 0 : i32
    %0 = arith.cmpi eq, %arg1, %c0_i32 : i32
    %1 = arith.extui %0 : i1 to i32
    %c0_i32_0 = arith.constant 0 : i32
    %2 = arith.cmpi ne, %1, %c0_i32_0 : i32
    scf.if %2 {
      %cst_9 = arith.constant 0.000000e+00 : f32
      %12 = vector.broadcast %cst_9 : f32 to vector<16x512xf32>
      %c0_10 = arith.constant 0 : index
      %c0_11 = arith.constant 0 : index
      %13 = vector.load %arg10[%c0_10, %c0_11] : memref<16x512xf32, #tpu.memory_space<vmem>>, vector<16x512xf32>
      tpu.vector_store %arg10[%c0_10, %c0_11], %12 {strides = array<i32>} : memref<16x512xf32, #tpu.memory_space<vmem>>, vector<16x512xf32>,
    } else {
    }
    %c0 = arith.constant 0 : index
    %c0_1 = arith.constant 0 : index
    %3 = vector.load %arg10[%c0, %c0_1] : memref<16x512xf32, #tpu.memory_space<vmem>>, vector<16x512xf32>
    %c0_2 = arith.constant 0 : index
    %c0_3 = arith.constant 0 : index
    %4 = vector.load %arg2[%c0_2, %c0_3] : memref<16x512xbf16, #tpu.memory_space<vmem>>, vector<16x512xbf16>
    %c0_4 = arith.constant 0 : index
    %c0_5 = arith.constant 0 : index
    %5 = vector.load %arg3[%c0_4, %c0_5] : memref<512x512xbf16, #tpu.memory_space<vmem>>, vector<512x512xbf16>
    %cst = arith.constant dense<0.000000e+00> : vector<16x512xf32>
    %6 = tpu.matmul %4, %5, %cst {dimension_numbers = #tpu.dot_dimension_numbers<[1], [0], [0], [1], [0, 0, 1, 1], [], []>} : vector<16x512xbf16>, vector<512x512xbf16>, vector<16x512xf32> -> vector<16x512xf32>
    %7 = arith.addf %3, %6 : vector<16x512xf32>
    %c0_6 = arith.constant 0 : index
    %c0_7 = arith.constant 0 : index
    %8 = vector.load %arg10[%c0_6, %c0_7] : memref<16x512xf32, #tpu.memory_space<vmem>>, vector<16x512xf32>
    tpu.vector_store %arg10[%c0_6, %c0_7], %7 {strides = array<i32>} : memref<16x512xf32, #tpu.memory_space<vmem>>, vector<16x512xf32>,
    %c1_i32 = arith.constant 1 : i32
    %9 = arith.cmpi eq, %arg1, %c1_i32 : i32
    %10 = arith.extui %9 : i1 to i32
    %c0_i32_8 = arith.constant 0 : i32
    %11 = arith.cmpi ne, %10, %c0_i32_8 : i32
    scf.if %11 {
      %c0_9 = arith.constant 0 : index
      %c0_10 = arith.constant 0 : index
      %12 = vector.load %arg4[%c0_9, %c0_10] : memref<1x512xf32, #tpu.memory_space<vmem>>, vector<1x512xf32>
      %c0_11 = arith.constant 0 : index
      %c0_12 = arith.constant 0 : index
      %13 = vector.load %arg6[%c0_11, %c0_12] : memref<1x512xf32, #tpu.memory_space<vmem>>, vector<1x512xf32>
      %c0_13 = arith.constant 0 : index
      %c0_14 = arith.constant 0 : index
      %14 = vector.load %arg8[%c0_13, %c0_14] : memref<1x128xf32, #tpu.memory_space<vmem>>, vector<1x128xf32>
      %c0_15 = arith.constant 0 : index
      %c0_16 = arith.constant 0 : index
      %15 = vector.load %arg10[%c0_15, %c0_16] : memref<16x512xf32, #tpu.memory_space<vmem>>, vector<16x512xf32>
      %16 = vector.broadcast %12 : vector<1x512xf32> to vector<16x512xf32>
      %17 = arith.addf %15, %16 : vector<16x512xf32>
      %cst_17 = arith.constant 0.000000e+00 : f32
      %18 = vector.broadcast %cst_17 : f32 to vector<16x512xf32>
      %19 = arith.maximumf %17, %18 : vector<16x512xf32>
      %20 = arith.truncf %19 : vector<16x512xf32> to vector<16x512xbf16>
      %c0_18 = arith.constant 0 : index
      %c0_19 = arith.constant 0 : index
      %21 = vector.load %arg5[%c0_18, %c0_19] : memref<512x512xbf16, #tpu.memory_space<vmem>>, vector<512x512xbf16>
      %cst_20 = arith.constant dense<0.000000e+00> : vector<16x512xf32>
      %22 = tpu.matmul %20, %21, %cst_20 {dimension_numbers = #tpu.dot_dimension_numbers<[1], [0], [0], [1], [0, 0, 1, 1], [], []>} : vector<16x512xbf16>, vector<512x512xbf16>, vector<16x512xf32> -> vector<16x512xf32>
      %23 = vector.broadcast %13 : vector<1x512xf32> to vector<16x512xf32>
      %24 = arith.addf %22, %23 : vector<16x512xf32>
      %cst_21 = arith.constant 0.000000e+00 : f32
      %25 = vector.broadcast %cst_21 : f32 to vector<16x512xf32>
      %26 = arith.maximumf %24, %25 : vector<16x512xf32>
      %27 = arith.truncf %26 : vector<16x512xf32> to vector<16x512xbf16>
      %c0_22 = arith.constant 0 : index
      %c0_23 = arith.constant 0 : index
      %28 = vector.load %arg7[%c0_22, %c0_23] : memref<512x128xbf16, #tpu.memory_space<vmem>>, vector<512x128xbf16>
      %cst_24 = arith.constant dense<0.000000e+00> : vector<16x128xf32>
      %29 = tpu.matmul %27, %28, %cst_24 {dimension_numbers = #tpu.dot_dimension_numbers<[1], [0], [0], [1], [0, 0, 1, 1], [], []>} : vector<16x512xbf16>, vector<512x128xbf16>, vector<16x128xf32> -> vector<16x128xf32>
      %30 = vector.broadcast %14 : vector<1x128xf32> to vector<16x128xf32>
      %31 = arith.addf %29, %30 : vector<16x128xf32>
      %c0_25 = arith.constant 0 : index
      %c0_26 = arith.constant 0 : index
      %32 = vector.load %arg9[%c0_25, %c0_26] : memref<16x128xf32, #tpu.memory_space<vmem>>, vector<16x128xf32>
      tpu.vector_store %arg9[%c0_25, %c0_26], %31 {strides = array<i32>} : memref<16x128xf32, #tpu.memory_space<vmem>>, vector<16x128xf32>,
    } else {
    }
    return
  }
  func.func @transform_0(%arg0: i32, %arg1: i32) -> (i32, i32) {
    %c0_i32 = arith.constant 0 : i32
    return %arg0, %arg1 : i32, i32
  }
  func.func @transform_1(%arg0: i32, %arg1: i32) -> (i32, i32) {
    %c0_i32 = arith.constant 0 : i32
    %c0_i32_0 = arith.constant 0 : i32
    return %arg1, %c0_i32 : i32, i32
  }
  func.func @transform_2(%arg0: i32, %arg1: i32) -> (i32, i32) {
    %c0_i32 = arith.constant 0 : i32
    %c0_i32_0 = arith.constant 0 : i32
    %c0_i32_1 = arith.constant 0 : i32
    return %c0_i32, %c0_i32_0 : i32, i32
  }
  func.func @transform_3(%arg0: i32, %arg1: i32) -> (i32, i32) {
    %c0_i32 = arith.constant 0 : i32
    %c0_i32_0 = arith.constant 0 : i32
    %c0_i32_1 = arith.constant 0 : i32
    return %c0_i32, %c0_i32_0 : i32, i32
  }
  func.func @transform_4(%arg0: i32, %arg1: i32) -> (i32, i32) {
    %c0_i32 = arith.constant 0 : i32
    %c0_i32_0 = arith.constant 0 : i32
    %c0_i32_1 = arith.constant 0 : i32
    return %c0_i32, %c0_i32_0 : i32, i32
  }
  func.func @transform_5(%arg0: i32, %arg1: i32) -> (i32, i32) {
    %c0_i32 = arith.constant 0 : i32
    %c0_i32_0 = arith.constant 0 : i32
    %c0_i32_1 = arith.constant 0 : i32
    return %c0_i32, %c0_i32_0 : i32, i32
  }
  func.func @transform_6(%arg0: i32, %arg1: i32) -> (i32, i32) {
    %c0_i32 = arith.constant 0 : i32
    %c0_i32_0 = arith.constant 0 : i32
    %c0_i32_1 = arith.constant 0 : i32
    return %c0_i32, %c0_i32_0 : i32, i32
  }
  func.func @transform_7(%arg0: i32, %arg1: i32) -> (i32, i32) {
    %c0_i32 = arith.constant 0 : i32
    %c0_i32_0 = arith.constant 0 : i32
    return %arg0, %c0_i32 : i32, i32
  }
}

</mosaic_0001>

<bundles_post_ra>
// kernel: tpu_custom_call.1
= control target key start
LH: loop header
LB: loop body
LE: loop exit
PB: predicated region body
PF: predicated region fallthrough
CT: control target
= control target key end

     0   :  { %s5428_s0 = inlined_call_operand.hbm [shape: bf16[16,1024], index: 0, kind: input, shape index: {}]   ;;  %s5429_s1 = inlined_call_operand.hbm [shape: bf16[1024,512], index: 1, kind: input, shape index: {}]   ;;  %s5430_s2 = inlined_call_operand.hbm [shape: f32[1,512], index: 2, kind: input, shape index: {}]   ;;  %s5431_s3 = inlined_call_operand.hbm [shape: bf16[512,512], index: 3, kind: input, shape index: {}]   ;;  %s5432_s4 = inlined_call_operand.hbm [shape: f32[1,512], index: 4, kind: input, shape index: {}]   ;;  %s5433_s5 = inlined_call_operand.hbm [shape: bf16[512,128], index: 5, kind: input, shape index: {}]   ;;  %s5434_s6 = inlined_call_operand.vmem [shape: f32[1,128], index: 6, kind: input, shape index: {}]   ;;  %s5435_s7 = inlined_call_operand.hbm [shape: f32[16,128], index: 7, kind: output, shape index: {}]  }
   0x1   :  { %5440 = sst [smem:[#allocation21_spill]] %s5428_s0 }
   0x2   :  { %5441 = sst [smem:[#allocation22_spill]] %s5430_s2 }
   0x3   :  { %5442 = sst [smem:[#allocation23_spill]] %s5431_s3 }
   0x4   :  { %5443 = sst [smem:[#allocation24_spill]] %s5432_s4 }
   0x5   :  { %5444 = sst [smem:[#allocation25_spill]] %s5433_s5 }
   0x6   :  { %12 = vsyncpa [#allocation4], 0 }
   0x7   :  { %14 = vsyncpa [#allocation4 + $0x1], 0 }
   0x8   :  { %15 = vsyncpa [#allocation7], 0 }
   0x9   :  { %17 = vsyncpa [#allocation7 + $0x1], 0 }
   0xa   :  { %18 = vsyncpa [#allocation10], 0 }
   0xb   :  { %19 = vsyncpa [#allocation13], 0 }
   0xc   :  { %20 = vsyncpa [#allocation5], 0  ;;  %s4923_s24 = smov 0   ;;  %s4925_s25 = smov 0  }
   0xd   :  { %s4927_s26 = smov 0   ;;  %s4929_s27 = smov 0  }
   0xe   :  { %s4931_s28 = smov 0   ;;  %s4933_s29 = smov 0  }
   0xf LB: > { %s4952_s30 = sadd.s32 4294967295, %s4868_s29   ;;  %p60_p0 = scmp.ne.s32.totalorder %s4852_s25, %s4848_s24  ;;  %s4868_s29 = sphi %s4933_s29, %s26_s29   ;;  %s4864_s28 = sphi %s4931_s28, %s5461_s28   ;;  %s4860_s27 = sphi %s4929_s27, %s5460_s27   ;;  %s4856_s26 = sphi %s4927_s26, %s5459_s26   ;;  %s4852_s25 = sphi %s4925_s25, %s5458_s25   ;;  %s4848_s24 = sphi %s4923_s24, %s5457_s24  }
  0x10   : > { %p61_p1 = scmp.eq.s32.totalorder %s4952_s30, 0  ;;  %p2984_p2 = scmp.ge.s32.totalorder %s4868_s29, 1 }
  0x11   : > { %p228_p3 = scmp.lt.s32.totalorder %s4868_s29, 3  ;;  %s5446_s2 = sld [smem:[#allocation22_spill]] }
  0x12   : > { %p4960_p4 = por %p61_p1, %p60_p0  ;;  %s4870_s13 = smov [#allocation8]  }
  0x13   : > { %p4967_p5 = pnand %p2984_p2, %p228_p3  ;;  %s242_s14 = sshll.u32 %s4870_s13, 4  ;;  %s243_s14 = int_to_ptr.vmem [resolvable:$true] %s242_s14 }
  0x14   : > { %s5448_s3 = sld [smem:[#allocation23_spill]]  ;;  %s4871_s19 = smov [#allocation9]  }
  0x15   : > { %p4497_p6 = pneg %p4967_p5  ;;  %s253_s20 = sshll.u32 %s4871_s19, 4  ;;  %s254_s20 = int_to_ptr.vmem [resolvable:$true] %s253_s20 }
  0x16   : > { %s5436_s21 = smov 256   ;;  %s5438_s22 = smov 16  }
  0x17   : > { %s240_s11 = sshll.u32 %s5446_s2, 4  ;;  %p4978_p7 = pnand %p4497_p6, %p61_p1  ;;  %s241_s11 = int_to_ptr.hbm [resolvable:$true] %s240_s11 }
  0x18   : > { %s5450_s4 = sld [smem:[#allocation24_spill]]  ;;  %s4874_s10 = smov [#allocation11]  }
  0x19   : > { %4500 = dma.hbm_to_vmem [thread:$0]  (!%p4978_p7), %s241_s11, 64, %s243_s14, [#allocation7]  }
  0x1a   : > { %s251_s17 = sshll.u32 %s5448_s3, 4  ;;  %s268_s11 = sshll.u32 %s4874_s10, 4  ;;  %s252_s17 = int_to_ptr.hbm [resolvable:$true] %s251_s17  ;;  %s269_s11 = int_to_ptr.vmem [resolvable:$true] %s268_s11 }
  0x1b   : > { %4503 = dma.hbm_to_vmem [thread:$0]  (!%p4978_p7), %s252_s17, 16384, %s254_s20, [#allocation10], %s5436_s21, %s5436_s21, %s5438_s22  }
  0x1c   : > { %s5451_s5 = sld [smem:[#allocation25_spill]]  ;;  %s4875_s16 = smov [#allocation12]  }
  0x1d   : > { %s279_s17 = sshll.u32 %s4875_s16, 4  ;;  %s4876_s19 = smov 64   ;;  %s280_s17 = int_to_ptr.vmem [resolvable:$true] %s279_s17 }
  0x1e   : > { %s266_s9 = sshll.u32 %s5450_s4, 4  ;;  %s4877_s20 = smov 4   ;;  %s267_s9 = int_to_ptr.hbm [resolvable:$true] %s266_s9 }
  0x1f   : > { %4506 = dma.hbm_to_vmem [thread:$0]  (!%p4978_p7), %s267_s9, 64, %s269_s11, [#allocation10]  }
  0x20   : > { %s35_s23 = sadd.s32 1, %s4864_s28  ;;  %s47_s24 = sadd.s32 1, %s4856_s26 }
  0x21   : > { %p36_p8 = scmp.ge.s32.totalorder %s35_s23, 2  ;;  %p54_p9 = scmp.ne.s32.totalorder %s4856_s26, %s4852_s25 }
  0x22   : > { %s277_s15 = sshll.u32 %s5451_s5, 4  ;;  %p55_p10 = scmp.eq.s32.totalorder %s4868_s29, 0  ;;  %s278_s15 = int_to_ptr.hbm [resolvable:$true] %s277_s15 }
  0x23   : > { %4509 = dma.hbm_to_vmem [thread:$0]  (!%p4978_p7), %s278_s15, 4096, %s280_s17, [#allocation13], %s4876_s19, %s4876_s19, %s4877_s20  }
  0x24   : > { %p4521_p11 = scmp.lt.s32.totalorder %s4868_s29, 2  ;;  %s5463_s23 = smov (%p36_p8, %s35_s23), 0 }
  0x25   : > { %p5007_p12 = por %p55_p10, %p54_p9  ;;  %s296_s10 = sand.u32 1, %s4856_s26  }
  0x26   : > { %s43_s11 = ssub.s32 %s4864_s28, %s5463_s23  ;;  %s2990_s18 = sshll.u32 %s296_s10, 5 }
  0x27   : > { %p45_p13 = scmp.eq.s32.totalorder %s43_s11, 0  ;;  %s4178_s13 = sshll.u32 %s4864_s28, 4 }
  0x28   : > { %s5453_s0 = sld [smem:[#allocation21_spill]]  ;;  %s300_s19 = scalar_lea.vmem [#allocation3], %s2990_s18 }
  0x29   : > { %s5016_s14 = scalar_select %p45_p13, %s4856_s26, %s47_s24  }
  0x2a   : > { %s311_s20 = sshll.u32 %s300_s19, 4  ;;  %p5025_p0 = pnand %p4521_p11, %p5007_p12  ;;  %s312_s20 = int_to_ptr.vmem [resolvable:$true] %s311_s20 }
  0x2b   : > { %s321_s11 = sand.u32 1, %s4868_s29   ;;  %s297_s24 = scalar_lea.sflag [#allocation4], %s296_s10 }
  0x2c   : > { %s4878_s2 = smov 512   ;;  %s5455_s3 = smov 16  }
  0x2d   : > { %s5456_s15 = smov 256   ;;  %s2993_s18 = sshll.u32 %s296_s10, 10 }
  0x2e   : > { %s308_s17 = scalar_lea.hbm %s5453_s0, %s4178_s13  ;;  %s4180_s13 = sshll.u32 %s4864_s28, 10 }
  0x2f   : > { %s309_s21 = sshll.u32 %s308_s17, 4  ;;  %s331_s9 = scalar_lea.hbm %s5429_s1, %s4180_s13  ;;  %s310_s21 = int_to_ptr.hbm [resolvable:$true] %s309_s21 }
  0x30   : > { %4513 = dma.hbm_to_vmem [thread:$0]  (!%p5025_p0), %s310_s21, 512, %s312_s20, %s297_s24, %s4878_s2, %s5456_s15, %s5455_s3  }
  0x31   : > { %s332_s19 = sshll.u32 %s331_s9, 4  ;;  %s325_s0 = scalar_lea.vmem [#allocation6], %s2993_s18  ;;  %s333_s19 = int_to_ptr.hbm [resolvable:$true] %s332_s19 }
  0x32   : > { %s334_s4 = sshll.u32 %s325_s0, 4  ;;  %s322_s5 = scalar_lea.sflag [#allocation7], %s321_s11  ;;  %s335_s4 = int_to_ptr.vmem [resolvable:$true] %s334_s4 }
  0x33   : > { %4516 = dma.hbm_to_vmem [thread:$0]  (!%p5025_p0), %s333_s19, 16384, %s335_s4, %s322_s5, %s5456_s15, %s5456_s15, %s5455_s3  }
  0x34   : > { %346 = sbr.rel (%p4967_p5) target bundleno = 791 (0x317), region = 48  ;;  %s348_s2 = sand.u32 (!%p4967_p5), 1, %s4852_s25  }
  0x35   : > { %s2998_s21 = sshll.u32 (!%p4967_p5), %s348_s2, 5  ;;  %s349_s10 = scalar_lea.sflag (!%p4967_p5), [#allocation4], %s348_s2 }
  0x36   : > { %s5046_s20 = scalar_lea.vmem (!%p4967_p5), [#allocation3], %s2998_s21 }
  0x39   : > { %4823 = dma.done.wait (%p4960_p4), %s349_s10, 512  }
  0x3a   : > { %4825 = vsyncadd (%p4960_p4), %s349_s10, 4294966784  ;;  %s358_s0 = sand.u32 1, %s4952_s30   ;;  %s2999_s22 = sshll.u32 %s348_s2, 10 }
  0x3b   : > { %s359_s3 = scalar_lea.sflag [#allocation7], %s358_s0  ;;  %s5053_s4 = scalar_lea.vmem [#allocation6], %s2999_s22 }
  0x3c   : > { %4827 = dma.done.wait (%p4960_p4), %s359_s3, 16384  }
  0x3d   : > { %4829 = vsyncadd (%p4960_p4), %s359_s3, 4294950912 }
  0x3e   : > { %4831 = dma.done.wait (%p61_p1), [#allocation7], 64  }
  0x3f   : > { %4833 = vsyncadd (%p61_p1), [#allocation7], 4294967232 }
  0x40   : > { %4835 = dma.done.wait (%p61_p1), [#allocation10], 16448  }
  0x41   : > { %4837 = vsyncadd (%p61_p1), [#allocation10], 4294950848 }
  0x42   : > { %4839 = dma.done.wait (%p61_p1), [#allocation13], 4096  }
  0x43   : > { %4841 = vsyncadd (%p61_p1), [#allocation13], 4294963200  ;;  %p3004_p2 = scmp.ne.s32.totalorder %s4860_s27, 0 }
  0x45   : > { %421 = sbr.rel (%p3004_p2) target bundleno = 83 (0x53), region = 76 }
  0x4a   : > { %v4879_v0 = vmov 0.0  }
  0x4b   : > { %422 = vst [vmem:[#allocation2 + $0x30] sm:$0xff] %v4879_v0 }
  0x4c   : > { %423 = vst [vmem:[#allocation2] sm:$0xff] %v4879_v0 }
  0x4d   : > { %424 = vst [vmem:[#allocation2 + $0x18] sm:$0xff] %v4879_v0 }
  0x4e   : > { %425 = vst [vmem:[#allocation2 + $0x10] sm:$0xff] %v4879_v0 }
  0x4f   : > { %426 = vst [vmem:[#allocation2 + $0x8] sm:$0xff] %v4879_v0 }
  0x50   : > { %427 = vst [vmem:[#allocation2 + $0x20] sm:$0xff] %v4879_v0 }
  0x51   : > { %428 = vst [vmem:[#allocation2 + $0x28] sm:$0xff] %v4879_v0 }
  0x52   : > { %429 = vst [vmem:[#allocation2 + $0x38] sm:$0xff] %v4879_v0 }
  0x53 PF: > { %v3135_v1 = vld [vmem:[%s5053_s4 + $0xe0] sm:$0xf]  ;;  %v4215_v2 = vld [vmem:[%s5053_s4 + $0xec] sm:$0xf0]  ;;  %p3533_p1 = scmp.ne.s32.totalorder %s4860_s27, 1 }
  0x54   : > { %v3263_v3 = vld [vmem:[%s5053_s4 + $0x1e0] sm:$0xf]  ;;  %v3136_v4 = vor.u32 %v4215_v2, %v3135_v1  ;;  %v4247_v5 = vld [vmem:[%s5053_s4 + $0x1ec] sm:$0xf0] }
  0x55   : > { %v3391_v6 = vld [vmem:[%s5053_s4 + $0x2e0] sm:$0xf]  ;;  %v4279_v7 = vld [vmem:[%s5053_s4 + $0x2ec] sm:$0xf0]  ;;  %v3264_v8 = vor.u32 %v4247_v5, %v3263_v3 }
  0x56   : > { %v3392_v9 = vor.u32 %v4279_v7, %v3391_v6  ;;  %v3519_v10 = vld [vmem:[%s5053_s4 + $0x3e0] sm:$0xf]  ;;  %v4311_v11 = vld [vmem:[%s5053_s4 + $0x3ec] sm:$0xf0]  ;;  %1230 = vmatpush.bf16.msra.mxu0 %v3136_v4 }
  0x57   : > { %v3119_v12 = vld [vmem:[%s5053_s4 + $0xc0] sm:$0xf]  ;;  %v3520_v13 = vor.u32 %v4311_v11, %v3519_v10  ;;  %v4211_v14 = vld [vmem:[%s5053_s4 + $0xcc] sm:$0xf0]  ;;  %1244 = vmatpush.bf16.msra.mxu1 %v3264_v8 }
  0x58   : > { %v3247_v15 = vld [vmem:[%s5053_s4 + $0x1c0] sm:$0xf]  ;;  %v4243_v16 = vld [vmem:[%s5053_s4 + $0x1cc] sm:$0xf0]  ;;  %1258 = vmatpush.bf16.msra.mxu2 %v3392_v9  ;;  %v3120_v17 = vor.u32 %v4211_v14, %v3119_v12 }
  0x59   : > { %v3248_v18 = vor.u32 %v4243_v16, %v3247_v15  ;;  %v3375_v19 = vld [vmem:[%s5053_s4 + $0x2c0] sm:$0xf]  ;;  %v4275_v20 = vld [vmem:[%s5053_s4 + $0x2cc] sm:$0xf0]  ;;  %1272 = vmatpush.bf16.msra.mxu3 %v3520_v13 }
  0x5a   : > { %v3503_v21 = vld [vmem:[%s5053_s4 + $0x3c0] sm:$0xf]  ;;  %v3376_v22 = vor.u32 %v4275_v20, %v3375_v19  ;;  %v4307_v23 = vld [vmem:[%s5053_s4 + $0x3cc] sm:$0xf0]  ;;  %1231 = vmatpush.bf16.msra.mxu0 %v3120_v17 }
  0x5b   : > { %v3103_v24 = vld [vmem:[%s5053_s4 + $0xa0] sm:$0xf]  ;;  %v4207_v25 = vld [vmem:[%s5053_s4 + $0xac] sm:$0xf0]  ;;  %v3504_v26 = vor.u32 %v4307_v23, %v3503_v21  ;;  %1245 = vmatpush.bf16.msra.mxu1 %v3248_v18 }
  0x5c   : > { %v3231_v27 = vld [vmem:[%s5053_s4 + $0x1a0] sm:$0xf]  ;;  %v4239_v28 = vld [vmem:[%s5053_s4 + $0x1ac] sm:$0xf0]  ;;  %v3104_v30 = vor.u32 %v4207_v25, %v3103_v24  ;;  %1259 = vmatpush.bf16.msra.mxu2 %v3376_v22 }
  0x5d   : > { %v3359_v29 = vld [vmem:[%s5053_s4 + $0x2a0] sm:$0xf]  ;;  %v4271_v31 = vld [vmem:[%s5053_s4 + $0x2ac] sm:$0xf0]  ;;  %v3232_v34 = vor.u32 %v4239_v28, %v3231_v27  ;;  %1273 = vmatpush.bf16.msra.mxu3 %v3504_v26 }
  0x5e   : > { %v3487_v32 = vld [vmem:[%s5053_s4 + $0x3a0] sm:$0xf]  ;;  %v4303_v33 = vld [vmem:[%s5053_s4 + $0x3ac] sm:$0xf0]  ;;  %v3360_v35 = vor.u32 %v4271_v31, %v3359_v29  ;;  %1232 = vmatpush.bf16.msra.mxu0 %v3104_v30  ;;  %v4213_v29 = vld [vmem:[%s5053_s4 + $0xe4] sm:$0xf] }
  0x5f   : > { %v3087_v36 = vld [vmem:[%s5053_s4 + $0x80] sm:$0xf]  ;;  %v4203_v37 = vld [vmem:[%s5053_s4 + $0x8c] sm:$0xf0]  ;;  %v3488_v39 = vor.u32 %v4303_v33, %v3487_v32  ;;  %1246 = vmatpush.bf16.msra.mxu1 %v3232_v34  ;;  %v3137_v30 = vld [vmem:[%s5053_s4 + $0xf0] sm:$0xf0] }
  0x60   : > { %v3215_v38 = vld [vmem:[%s5053_s4 + $0x180] sm:$0xf]  ;;  %v4235_v40 = vld [vmem:[%s5053_s4 + $0x18c] sm:$0xf0]  ;;  %v3088_v45 = vor.u32 %v4203_v37, %v3087_v36  ;;  %1260 = vmatpush.bf16.msra.mxu2 %v3360_v35  ;;  %v4245_v31 = vld [vmem:[%s5053_s4 + $0x1e4] sm:$0xf] }
  0x61   : > { %v3343_v41 = vld [vmem:[%s5053_s4 + $0x280] sm:$0xf]  ;;  %v4267_v42 = vld [vmem:[%s5053_s4 + $0x28c] sm:$0xf0]  ;;  %v3216_v46 = vor.u32 %v4235_v40, %v3215_v38  ;;  %1274 = vmatpush.bf16.msra.mxu3 %v3488_v39  ;;  %v3265_v33 = vld [vmem:[%s5053_s4 + $0x1f0] sm:$0xf0] }
  0x62   : > { %v3471_v43 = vld [vmem:[%s5053_s4 + $0x380] sm:$0xf]  ;;  %v4299_v44 = vld [vmem:[%s5053_s4 + $0x38c] sm:$0xf0]  ;;  %v3344_v47 = vor.u32 %v4267_v42, %v3343_v41  ;;  %1233 = vmatpush.bf16.msra.mxu0 %v3088_v45  ;;  %v4277_v34 = vld [vmem:[%s5053_s4 + $0x2e4] sm:$0xf]  ;;  %v3140_v41 = vor.u32 %v4213_v29, %v3137_v30  ;;  %v3268_v42 = vor.u32 %v4245_v31, %v3265_v33 }
  0x63   : > { %v3071_v48 = vld [vmem:[%s5053_s4 + $0x60] sm:$0xf]  ;;  %v4199_v49 = vld [vmem:[%s5053_s4 + $0x6c] sm:$0xf0]  ;;  %v3472_v51 = vor.u32 %v4299_v44, %v3471_v43  ;;  %1247 = vmatpush.bf16.msra.mxu1 %v3216_v46  ;;  %v3393_v35 = vld [vmem:[%s5053_s4 + $0x2f0] sm:$0xf0] }
  0x64   : > { %v3199_v50 = vld [vmem:[%s5053_s4 + $0x160] sm:$0xf]  ;;  %v4231_v52 = vld [vmem:[%s5053_s4 + $0x16c] sm:$0xf0]  ;;  %v3072_v57 = vor.u32 %v4199_v49, %v3071_v48  ;;  %1261 = vmatpush.bf16.msra.mxu2 %v3344_v47  ;;  %v4309_v38 = vld [vmem:[%s5053_s4 + $0x3e4] sm:$0xf]  ;;  %v3396_v43 = vor.u32 %v4277_v34, %v3393_v35 }
  0x65   : > { %v3327_v53 = vld [vmem:[%s5053_s4 + $0x260] sm:$0xf]  ;;  %v4263_v54 = vld [vmem:[%s5053_s4 + $0x26c] sm:$0xf0]  ;;  %v3200_v58 = vor.u32 %v4231_v52, %v3199_v50  ;;  %1275 = vmatpush.bf16.msra.mxu3 %v3472_v51  ;;  %v3521_v39 = vld [vmem:[%s5053_s4 + $0x3f0] sm:$0xf0] }
  0x66   : > { %v3455_v55 = vld [vmem:[%s5053_s4 + $0x360] sm:$0xf]  ;;  %v4295_v56 = vld [vmem:[%s5053_s4 + $0x36c] sm:$0xf0]  ;;  %v3328_v59 = vor.u32 %v4263_v54, %v3327_v53  ;;  %1234 = vmatpush.bf16.msra.mxu0 %v3072_v57  ;;  %v4209_v44 = vld [vmem:[%s5053_s4 + $0xc4] sm:$0xf]  ;;  %v3524_v47 = vor.u32 %v4309_v38, %v3521_v39 }
  0x67   : > { %v3055_v60 = vld [vmem:[%s5053_s4 + $0x40] sm:$0xf]  ;;  %v4195_v61 = vld [vmem:[%s5053_s4 + $0x4c] sm:$0xf0]  ;;  %v3456_v63 = vor.u32 %v4295_v56, %v3455_v55  ;;  %1248 = vmatpush.bf16.msra.mxu1 %v3200_v58  ;;  %v3121_v45 = vld [vmem:[%s5053_s4 + $0xd0] sm:$0xf0] }
  0x68   : > { %v3183_v62 = vld [vmem:[%s5053_s4 + $0x140] sm:$0xf]  ;;  %v4227_v0 = vld [vmem:[%s5053_s4 + $0x14c] sm:$0xf0]  ;;  %v3056_v5 = vor.u32 %v4195_v61, %v3055_v60  ;;  %1262 = vmatpush.bf16.msra.mxu2 %v3328_v59  ;;  %v4241_v46 = vld [vmem:[%s5053_s4 + $0x1c4] sm:$0xf]  ;;  %v3124_v53 = vor.u32 %v4209_v44, %v3121_v45 }
  0x69   : > { %v3311_v1 = vld [vmem:[%s5053_s4 + $0x240] sm:$0xf]  ;;  %v4259_v2 = vld [vmem:[%s5053_s4 + $0x24c] sm:$0xf0]  ;;  %v3184_v6 = vor.u32 %v4227_v0, %v3183_v62  ;;  %1276 = vmatpush.bf16.msra.mxu3 %v3456_v63  ;;  %v3249_v48 = vld [vmem:[%s5053_s4 + $0x1d0] sm:$0xf0] }
  0x6a   : > { %v3439_v3 = vld [vmem:[%s5053_s4 + $0x340] sm:$0xf]  ;;  %v4291_v4 = vld [vmem:[%s5053_s4 + $0x34c] sm:$0xf0]  ;;  %v3312_v7 = vor.u32 %v4259_v2, %v3311_v1  ;;  %1235 = vmatpush.bf16.msra.mxu0 %v3056_v5  ;;  %v4273_v49 = vld [vmem:[%s5053_s4 + $0x2c4] sm:$0xf]  ;;  %v3252_v54 = vor.u32 %v4241_v46, %v3249_v48 }
  0x6b   : > { %v3039_v8 = vld [vmem:[%s5053_s4 + $0x20] sm:$0xf]  ;;  %v4191_v9 = vld [vmem:[%s5053_s4 + $0x2c] sm:$0xf0]  ;;  %v3440_v11 = vor.u32 %v4291_v4, %v3439_v3  ;;  %1249 = vmatpush.bf16.msra.mxu1 %v3184_v6  ;;  %v3377_v50 = vld [vmem:[%s5053_s4 + $0x2d0] sm:$0xf0] }
  0x6c   : > { %v3167_v10 = vld [vmem:[%s5053_s4 + $0x120] sm:$0xf]  ;;  %v4223_v12 = vld [vmem:[%s5053_s4 + $0x12c] sm:$0xf0]  ;;  %v3040_v17 = vor.u32 %v4191_v9, %v3039_v8  ;;  %1263 = vmatpush.bf16.msra.mxu2 %v3312_v7  ;;  %v4305_v51 = vld [vmem:[%s5053_s4 + $0x3c4] sm:$0xf]  ;;  %v3380_v55 = vor.u32 %v4273_v49, %v3377_v50 }
  0x6d   : > { %v3295_v13 = vld [vmem:[%s5053_s4 + $0x220] sm:$0xf]  ;;  %v4255_v14 = vld [vmem:[%s5053_s4 + $0x22c] sm:$0xf0]  ;;  %v3168_v20 = vor.u32 %v4223_v12, %v3167_v10  ;;  %1277 = vmatpush.bf16.msra.mxu3 %v3440_v11  ;;  %v3505_v52 = vld [vmem:[%s5053_s4 + $0x3d0] sm:$0xf0] }
  0x6e   : > { %v3423_v15 = vld [vmem:[%s5053_s4 + $0x320] sm:$0xf]  ;;  %v4287_v16 = vld [vmem:[%s5053_s4 + $0x32c] sm:$0xf0]  ;;  %v3296_v21 = vor.u32 %v4255_v14, %v3295_v13  ;;  %1236 = vmatpush.bf16.msra.mxu0 %v3040_v17  ;;  %v4205_v56 = vld [vmem:[%s5053_s4 + $0xa4] sm:$0xf]  ;;  %v3508_v59 = vor.u32 %v4305_v51, %v3505_v52 }
  0x6f   : > { %v3023_v18 = vld [vmem:[%s5053_s4] sm:$0xf]  ;;  %v4187_v19 = vld [vmem:[%s5053_s4 + $0xc] sm:$0xf0]  ;;  %v3424_v25 = vor.u32 %v4287_v16, %v3423_v15  ;;  %1250 = vmatpush.bf16.msra.mxu1 %v3168_v20  ;;  %v3105_v57 = vld [vmem:[%s5053_s4 + $0xb0] sm:$0xf0] }
  0x70   : > { %v3151_v22 = vld [vmem:[%s5053_s4 + $0x100] sm:$0xf]  ;;  %v4219_v23 = vld [vmem:[%s5053_s4 + $0x10c] sm:$0xf0]  ;;  %v3024_v32 = vor.u32 %v4187_v19, %v3023_v18  ;;  %1264 = vmatpush.bf16.msra.mxu2 %v3296_v21  ;;  %v4237_v58 = vld [vmem:[%s5053_s4 + $0x1a4] sm:$0xf]  ;;  %v3108_v2 = vor.u32 %v4205_v56, %v3105_v57 }
  0x71   : > { %v3279_v24 = vld [vmem:[%s5053_s4 + $0x200] sm:$0xf]  ;;  %v4251_v26 = vld [vmem:[%s5053_s4 + $0x20c] sm:$0xf0]  ;;  %v3152_v36 = vor.u32 %v4219_v23, %v3151_v22  ;;  %1278 = vmatpush.bf16.msra.mxu3 %v3424_v25  ;;  %v3233_v60 = vld [vmem:[%s5053_s4 + $0x1b0] sm:$0xf0] }
  0x72   : > { %v3407_v27 = vld [vmem:[%s5053_s4 + $0x300] sm:$0xf]  ;;  %v4283_v28 = vld [vmem:[%s5053_s4 + $0x30c] sm:$0xf0]  ;;  %v3280_v37 = vor.u32 %v4251_v26, %v3279_v24  ;;  %1237 = vmatpush.bf16.msra.mxu0 %v3024_v32  ;;  %v4269_v61 = vld [vmem:[%s5053_s4 + $0x2a4] sm:$0xf]  ;;  %v3236_v6 = vor.u32 %v4237_v58, %v3233_v60 }
  0x73   : > { %v3408_v40 = vor.u32 %v4283_v28, %v3407_v27  ;;  %1251 = vmatpush.bf16.msra.mxu1 %v3152_v36  ;;  %v3361_v62 = vld [vmem:[%s5053_s4 + $0x2b0] sm:$0xf0]  ;;  %v4301_v63 = vld [vmem:[%s5053_s4 + $0x3a4] sm:$0xf]  ;;  %v3015_v4 = vld [vmem:[%s5046_s20 + $0x8] sm:$0xf] }
  0x74   : > { %1265 = vmatpush.bf16.msra.mxu2 %v3280_v37  ;;  %v3489_v0 = vld [vmem:[%s5053_s4 + $0x3b0] sm:$0xf0]  ;;  %v4201_v1 = vld [vmem:[%s5053_s4 + $0x84] sm:$0xf]  ;;  %v4184_v5 = vld [vmem:[%s5046_s20 + $0x14] sm:$0xf0]  ;;  %v3364_v7 = vor.u32 %v4269_v61, %v3361_v62 }
  0x75   : > { %1279 = vmatpush.bf16.msra.mxu3 %v3408_v40  ;;  %v3089_v3 = vld [vmem:[%s5053_s4 + $0x90] sm:$0xf0]  ;;  %v4233_v8 = vld [vmem:[%s5053_s4 + $0x184] sm:$0xf]  ;;  %v5165_v9 = vor.u32 %v4184_v5, %v3015_v4  ;;  %v4182_v10 = vld [vmem:[%s5046_s20 + $0xc] sm:$0xf]  ;;  %v3492_v12 = vor.u32 %v4301_v63, %v3489_v0 }
  0x76   : > { %1286 = vmatpush.bf16.msrb.mxu0 %v3140_v41  ;;  %v3017_v11 = vld [vmem:[%s5046_s20 + $0x18] sm:$0xf0]  ;;  %v3217_v13 = vld [vmem:[%s5053_s4 + $0x190] sm:$0xf0]  ;;  %v4265_v14 = vld [vmem:[%s5053_s4 + $0x284] sm:$0xf]  ;;  %v3092_v20 = vor.u32 %v4201_v1, %v3089_v3 }
  0x77   : > { %1300 = vmatpush.bf16.msrb.mxu1 %v3268_v42  ;;  %v3345_v15 = vld [vmem:[%s5053_s4 + $0x290] sm:$0xf0]  ;;  %v5172_v16 = vor.u32 %v4182_v10, %v3017_v11  ;;  %v4297_v17 = vld [vmem:[%s5053_s4 + $0x384] sm:$0xf]  ;;  %1266 = vmatmul.bf16.vlgmr.msra.gmra.mxu2 %v5165_v9  ;;  %v3007_v22 = vld [vmem:[%s5046_s20] sm:$0xf]  ;;  %v3220_v24 = vor.u32 %v4233_v8, %v3217_v13 }
  0x78   : > { %1314 = vmatpush.bf16.msrb.mxu2 %v3396_v43  ;;  %v3473_v18 = vld [vmem:[%s5053_s4 + $0x390] sm:$0xf0]  ;;  %v4197_v19 = vld [vmem:[%s5053_s4 + $0x64] sm:$0xf]  ;;  %v4183_v23 = vld [vmem:[%s5046_s20 + $0xc] sm:$0xf0]  ;;  %v3348_v25 = vor.u32 %v4265_v14, %v3345_v15 }
  0x79   : > { %1328 = vmatpush.bf16.msrb.mxu3 %v3524_v47  ;;  %v3073_v21 = vld [vmem:[%s5053_s4 + $0x70] sm:$0xf0]  ;;  %v4229_v26 = vld [vmem:[%s5053_s4 + $0x164] sm:$0xf]  ;;  %v5183_v27 = vor.u32 %v4183_v23, %v3007_v22  ;;  %v3476_v30 = vor.u32 %v4297_v17, %v3473_v18  ;;  %v3143_v10 = vld [vmem:[%s5053_s4 + $0xe8] sm:$0xf] }
  0x7a   : > { %1287 = vmatpush.bf16.msrb.mxu0 %v3124_v53  ;;  %1280 = vmatmul.bf16.vlgmr.msra.gmra.mxu3 %v5172_v16  ;;  %v4181_v28 = vld [vmem:[%s5046_s20 + $0x4] sm:$0xf]  ;;  %v3009_v29 = vld [vmem:[%s5046_s20 + $0x10] sm:$0xf0]  ;;  %v3076_v37 = vor.u32 %v4197_v19, %v3073_v21  ;;  %v4216_v11 = vld [vmem:[%s5053_s4 + $0xf4] sm:$0xf0] }
  0x7b   : > { %1301 = vmatpush.bf16.msrb.mxu1 %v3252_v54  ;;  %v3201_v31 = vld [vmem:[%s5053_s4 + $0x170] sm:$0xf0]  ;;  %v4261_v32 = vld [vmem:[%s5053_s4 + $0x264] sm:$0xf]  ;;  %v5190_v34 = vor.u32 %v4181_v28, %v3009_v29  ;;  %1238 = vmatmul.bf16.vlgmr.msra.gmra.mxu0 %v5183_v27  ;;  %v4248_v14 = vld [vmem:[%s5053_s4 + $0x1f4] sm:$0xf0]  ;;  %v3144_v23 = vor.u32 %v4216_v11, %v3143_v10 }
  0x7c   : > { %1315 = vmatpush.bf16.msrb.mxu2 %v3380_v55  ;;  %v3329_v33 = vld [vmem:[%s5053_s4 + $0x270] sm:$0xf0]  ;;  %v4293_v35 = vld [vmem:[%s5053_s4 + $0x364] sm:$0xf]  ;;  %v3204_v38 = vor.u32 %v4229_v26, %v3201_v31  ;;  %v3399_v15 = vld [vmem:[%s5053_s4 + $0x2e8] sm:$0xf] }
  0x7d   : > { %1329 = vmatpush.bf16.msrb.mxu3 %v3508_v59  ;;  %v3457_v36 = vld [vmem:[%s5053_s4 + $0x370] sm:$0xf0]  ;;  %1252 = vmatmul.bf16.vlgmr.msra.gmra.mxu1 %v5190_v34  ;;  %v3332_v39 = vor.u32 %v4261_v32, %v3329_v33  ;;  %v4193_v40 = vld [vmem:[%s5053_s4 + $0x44] sm:$0xf]  ;;  %v4280_v17 = vld [vmem:[%s5053_s4 + $0x2f4] sm:$0xf0] }
  0x7e   : > { %1288 = vmatpush.bf16.msrb.mxu0 %v3108_v2  ;;  %v3057_v41 = vld [vmem:[%s5053_s4 + $0x50] sm:$0xf0]  ;;  %v4225_v42 = vld [vmem:[%s5053_s4 + $0x144] sm:$0xf]  ;;  %v3460_v43 = vor.u32 %v4293_v35, %v3457_v36  ;;  %v4312_v21 = vld [vmem:[%s5053_s4 + $0x3f4] sm:$0xf0] }
  0x7f   : > { %1302 = vmatpush.bf16.msrb.mxu1 %v3236_v6  ;;  %v3185_v44 = vld [vmem:[%s5053_s4 + $0x150] sm:$0xf0]  ;;  %v4257_v45 = vld [vmem:[%s5053_s4 + $0x244] sm:$0xf]  ;;  %v3060_v49 = vor.u32 %v4193_v40, %v3057_v41  ;;  %v3127_v26 = vld [vmem:[%s5053_s4 + $0xc8] sm:$0xf] }
  0x80   : > { %1316 = vmatpush.bf16.msrb.mxu2 %v3364_v7  ;;  %v3313_v46 = vld [vmem:[%s5053_s4 + $0x250] sm:$0xf0]  ;;  %v4289_v47 = vld [vmem:[%s5053_s4 + $0x344] sm:$0xf]  ;;  %v3188_v50 = vor.u32 %v4225_v42, %v3185_v44  ;;  %v4212_v28 = vld [vmem:[%s5053_s4 + $0xd4] sm:$0xf0] }
  0x81   : > { %1330 = vmatpush.bf16.msrb.mxu3 %v3492_v12  ;;  %v3441_v48 = vld [vmem:[%s5053_s4 + $0x350] sm:$0xf0]  ;;  %v3316_v51 = vor.u32 %v4257_v45, %v3313_v46  ;;  %v4189_v52 = vld [vmem:[%s5053_s4 + $0x24] sm:$0xf]  ;;  %v3271_v12 = vld [vmem:[%s5053_s4 + $0x1e8] sm:$0xf] }
  0x82   : > { %1289 = vmatpush.bf16.msrb.mxu0 %v3092_v20  ;;  %v3041_v53 = vld [vmem:[%s5053_s4 + $0x30] sm:$0xf0]  ;;  %v4221_v54 = vld [vmem:[%s5053_s4 + $0x124] sm:$0xf]  ;;  %v3444_v55 = vor.u32 %v4289_v47, %v3441_v48  ;;  %v3527_v20 = vld [vmem:[%s5053_s4 + $0x3e8] sm:$0xf] }
  0x83   : > { %1303 = vmatpush.bf16.msrb.mxu1 %v3220_v24  ;;  %v3169_v56 = vld [vmem:[%s5053_s4 + $0x130] sm:$0xf0]  ;;  %v4253_v57 = vld [vmem:[%s5053_s4 + $0x224] sm:$0xf]  ;;  %v3044_v61 = vor.u32 %v4189_v52, %v3041_v53  ;;  %v3272_v24 = vor.u32 %v4248_v14, %v3271_v12  ;;  %v3255_v29 = vld [vmem:[%s5053_s4 + $0x1c8] sm:$0xf] }
  0x84   : > { %1317 = vmatpush.bf16.msrb.mxu2 %v3348_v25  ;;  %v3297_v58 = vld [vmem:[%s5053_s4 + $0x230] sm:$0xf0]  ;;  %v4285_v59 = vld [vmem:[%s5053_s4 + $0x324] sm:$0xf]  ;;  %v3172_v0 = vor.u32 %v4221_v54, %v3169_v56  ;;  %v3400_v25 = vor.u32 %v4280_v17, %v3399_v15  ;;  %v4244_v31 = vld [vmem:[%s5053_s4 + $0x1d4] sm:$0xf0] }
  0x85   : > { %1331 = vmatpush.bf16.msrb.mxu3 %v3476_v30  ;;  %v3425_v60 = vld [vmem:[%s5053_s4 + $0x330] sm:$0xf0]  ;;  %v4185_v62 = vld [vmem:[%s5053_s4 + $0x4] sm:$0xf]  ;;  %v3300_v1 = vor.u32 %v4253_v57, %v3297_v58  ;;  %v3528_v30 = vor.u32 %v4312_v21, %v3527_v20  ;;  %v3383_v32 = vld [vmem:[%s5053_s4 + $0x2c8] sm:$0xf] }
  0x86   : > { %1290 = vmatpush.bf16.msrb.mxu0 %v3076_v37  ;;  %v3025_v63 = vld [vmem:[%s5053_s4 + $0x10] sm:$0xf0]  ;;  %v4217_v2 = vld [vmem:[%s5053_s4 + $0x104] sm:$0xf]  ;;  %v3428_v5 = vor.u32 %v4285_v59, %v3425_v60  ;;  %v4276_v33 = vld [vmem:[%s5053_s4 + $0x2d4] sm:$0xf0]  ;;  %v3128_v37 = vor.u32 %v4212_v28, %v3127_v26 }
  0x87   : > { %1304 = vmatpush.bf16.msrb.mxu1 %v3204_v38  ;;  %v3153_v3 = vld [vmem:[%s5053_s4 + $0x110] sm:$0xf0]  ;;  %v4249_v4 = vld [vmem:[%s5053_s4 + $0x204] sm:$0xf]  ;;  %v3028_v13 = vor.u32 %v4185_v62, %v3025_v63  ;;  %v3511_v35 = vld [vmem:[%s5053_s4 + $0x3c8] sm:$0xf]  ;;  %v3256_v38 = vor.u32 %v4244_v31, %v3255_v29 }
  0x88   : > { %1318 = vmatpush.bf16.msrb.mxu2 %v3332_v39  ;;  %v3281_v6 = vld [vmem:[%s5053_s4 + $0x210] sm:$0xf0]  ;;  %v4281_v7 = vld [vmem:[%s5053_s4 + $0x304] sm:$0xf]  ;;  %v3156_v18 = vor.u32 %v4217_v2, %v3153_v3  ;;  %v4308_v36 = vld [vmem:[%s5053_s4 + $0x3d4] sm:$0xf0]  ;;  %v3384_v39 = vor.u32 %v4276_v33, %v3383_v32 }
  0x89   : > { %1332 = vmatpush.bf16.msrb.mxu3 %v3460_v43  ;;  %v3409_v8 = vld [vmem:[%s5053_s4 + $0x310] sm:$0xf0]  ;;  %v3284_v19 = vor.u32 %v4249_v4, %v3281_v6  ;;  %v3111_v40 = vld [vmem:[%s5053_s4 + $0xa8] sm:$0xf]  ;;  %v4208_v41 = vld [vmem:[%s5053_s4 + $0xb4] sm:$0xf0]  ;;  %v3512_v43 = vor.u32 %v4308_v36, %v3511_v35 }
  0x8a   : > { %1291 = vmatpush.bf16.msrb.mxu0 %v3060_v49  ;;  %v3412_v22 = vor.u32 %v4281_v7, %v3409_v8  ;;  %v3239_v42 = vld [vmem:[%s5053_s4 + $0x1a8] sm:$0xf]  ;;  %v4240_v44 = vld [vmem:[%s5053_s4 + $0x1b4] sm:$0xf0]  ;;  %v3112_v49 = vor.u32 %v4208_v41, %v3111_v40 }
  0x8b   : > { %1305 = vmatpush.bf16.msrb.mxu1 %v3188_v50  ;;  %v3367_v45 = vld [vmem:[%s5053_s4 + $0x2a8] sm:$0xf]  ;;  %v4272_v46 = vld [vmem:[%s5053_s4 + $0x2b4] sm:$0xf0]  ;;  %v3240_v50 = vor.u32 %v4240_v44, %v3239_v42 }
  0x8c   : > { %1319 = vmatpush.bf16.msrb.mxu2 %v3316_v51  ;;  %v3495_v47 = vld [vmem:[%s5053_s4 + $0x3a8] sm:$0xf]  ;;  %v4304_v48 = vld [vmem:[%s5053_s4 + $0x3b4] sm:$0xf0]  ;;  %v3368_v51 = vor.u32 %v4272_v46, %v3367_v45 }
  0x8d   : > { %1333 = vmatpush.bf16.msrb.mxu3 %v3444_v55  ;;  %v3095_v52 = vld [vmem:[%s5053_s4 + $0x88] sm:$0xf]  ;;  %v4204_v53 = vld [vmem:[%s5053_s4 + $0x94] sm:$0xf0]  ;;  %v3496_v55 = vor.u32 %v4304_v48, %v3495_v47 }
  0x8e   : > { %1292 = vmatpush.bf16.msrb.mxu0 %v3044_v61  ;;  %v3223_v54 = vld [vmem:[%s5053_s4 + $0x188] sm:$0xf]  ;;  %v4236_v56 = vld [vmem:[%s5053_s4 + $0x194] sm:$0xf0]  ;;  %v3096_v61 = vor.u32 %v4204_v53, %v3095_v52  ;;  %v3273_v53 = vld [vmem:[%s5053_s4 + $0x1f8] sm:$0xf0] }
  0x8f   : > { %1306 = vmatpush.bf16.msrb.mxu1 %v3172_v0  ;;  %v3351_v57 = vld [vmem:[%s5053_s4 + $0x288] sm:$0xf]  ;;  %v4268_v58 = vld [vmem:[%s5053_s4 + $0x294] sm:$0xf0]  ;;  %v3224_v62 = vor.u32 %v4236_v56, %v3223_v54  ;;  %v4278_v54 = vld [vmem:[%s5053_s4 + $0x2ec] sm:$0xf] }
  0x90   : > { %1320 = vmatpush.bf16.msrb.mxu2 %v3300_v1  ;;  %v3479_v59 = vld [vmem:[%s5053_s4 + $0x388] sm:$0xf]  ;;  %v4300_v60 = vld [vmem:[%s5053_s4 + $0x394] sm:$0xf0]  ;;  %v3352_v63 = vor.u32 %v4268_v58, %v3351_v57  ;;  %v4310_v58 = vld [vmem:[%s5053_s4 + $0x3ec] sm:$0xf] }
  0x91   : > { %1334 = vmatpush.bf16.msrb.mxu3 %v3428_v5  ;;  %v3079_v0 = vld [vmem:[%s5053_s4 + $0x68] sm:$0xf]  ;;  %v4200_v1 = vld [vmem:[%s5053_s4 + $0x74] sm:$0xf0]  ;;  %v3480_v3 = vor.u32 %v4300_v60, %v3479_v59  ;;  %v3529_v59 = vld [vmem:[%s5053_s4 + $0x3f8] sm:$0xf0] }
  0x92   : > { %1293 = vmatpush.bf16.msrb.mxu0 %v3028_v13  ;;  %v3207_v2 = vld [vmem:[%s5053_s4 + $0x168] sm:$0xf]  ;;  %v4232_v4 = vld [vmem:[%s5053_s4 + $0x174] sm:$0xf0]  ;;  %v3080_v10 = vor.u32 %v4200_v1, %v3079_v0  ;;  %v4210_v0 = vld [vmem:[%s5053_s4 + $0xcc] sm:$0xf] }
  0x93   : > { %1307 = vmatpush.bf16.msrb.mxu1 %v3156_v18  ;;  %v3335_v5 = vld [vmem:[%s5053_s4 + $0x268] sm:$0xf]  ;;  %v4264_v6 = vld [vmem:[%s5053_s4 + $0x274] sm:$0xf0]  ;;  %v3208_v11 = vor.u32 %v4232_v4, %v3207_v2  ;;  %v3129_v1 = vld [vmem:[%s5053_s4 + $0xd8] sm:$0xf0] }
  0x94   : > { %1321 = vmatpush.bf16.msrb.mxu2 %v3284_v19  ;;  %v3463_v7 = vld [vmem:[%s5053_s4 + $0x368] sm:$0xf]  ;;  %v4296_v8 = vld [vmem:[%s5053_s4 + $0x374] sm:$0xf0]  ;;  %v3336_v12 = vor.u32 %v4264_v6, %v3335_v5  ;;  %v4242_v2 = vld [vmem:[%s5053_s4 + $0x1cc] sm:$0xf] }
  0x95   : > { %1335 = vmatpush.bf16.msrb.mxu3 %v3412_v22  ;;  %1294 = vmatmul.bf16.vlgmr.msrb.gmra.mxu0 %v5183_v27  ;;  %v3063_v13 = vld [vmem:[%s5053_s4 + $0x48] sm:$0xf]  ;;  %v4196_v14 = vld [vmem:[%s5053_s4 + $0x54] sm:$0xf0]  ;;  %v3464_v17 = vor.u32 %v4296_v8, %v3463_v7  ;;  %v3257_v4 = vld [vmem:[%s5053_s4 + $0x1d8] sm:$0xf0] }
  0x96   : > { %1342 = vmatpush.bf16.msra.mxu0 %v3144_v23  ;;  %1308 = vmatmul.bf16.vlgmr.msrb.gmra.mxu1 %v5190_v34  ;;  %v3191_v15 = vld [vmem:[%s5053_s4 + $0x148] sm:$0xf]  ;;  %v4228_v18 = vld [vmem:[%s5053_s4 + $0x154] sm:$0xf0]  ;;  %v3064_v23 = vor.u32 %v4196_v14, %v3063_v13  ;;  %v4274_v5 = vld [vmem:[%s5053_s4 + $0x2cc] sm:$0xf] }
  0x97   : > { %1356 = vmatpush.bf16.msra.mxu1 %v3272_v24  ;;  %1322 = vmatmul.bf16.vlgmr.msrb.gmra.mxu2 %v5165_v9  ;;  %v3319_v19 = vld [vmem:[%s5053_s4 + $0x248] sm:$0xf]  ;;  %v4260_v20 = vld [vmem:[%s5053_s4 + $0x254] sm:$0xf0]  ;;  %v3192_v24 = vor.u32 %v4228_v18, %v3191_v15  ;;  %v3385_v6 = vld [vmem:[%s5053_s4 + $0x2d8] sm:$0xf0] }
  0x98   : > { %1370 = vmatpush.bf16.msra.mxu2 %v3400_v25  ;;  %1336 = vmatmul.bf16.vlgmr.msrb.gmra.mxu3 %v5172_v16  ;;  %v3447_v21 = vld [vmem:[%s5053_s4 + $0x348] sm:$0xf]  ;;  %v4292_v22 = vld [vmem:[%s5053_s4 + $0x354] sm:$0xf0]  ;;  %v3320_v25 = vor.u32 %v4260_v20, %v3319_v19  ;;  %v4306_v7 = vld [vmem:[%s5053_s4 + $0x3cc] sm:$0xf] }
  0x99   : > { %1384 = vmatpush.bf16.msra.mxu3 %v3528_v30  ;;  %v3047_v26 = vld [vmem:[%s5053_s4 + $0x28] sm:$0xf]  ;;  %v4192_v28 = vld [vmem:[%s5053_s4 + $0x34] sm:$0xf0]  ;;  %v3448_v30 = vor.u32 %v4292_v22, %v3447_v21  ;;  %v3513_v8 = vld [vmem:[%s5053_s4 + $0x3d8] sm:$0xf0] }
  0x9a   : > { %1343 = vmatpush.bf16.msra.mxu0 %v3128_v37  ;;  %v3175_v29 = vld [vmem:[%s5053_s4 + $0x128] sm:$0xf]  ;;  %v4224_v31 = vld [vmem:[%s5053_s4 + $0x134] sm:$0xf0]  ;;  %v3048_v37 = vor.u32 %v4192_v28, %v3047_v26  ;;  %v4206_v13 = vld [vmem:[%s5053_s4 + $0xac] sm:$0xf] }
  0x9b   : > { %1357 = vmatpush.bf16.msra.mxu1 %v3256_v38  ;;  %v3303_v32 = vld [vmem:[%s5053_s4 + $0x228] sm:$0xf]  ;;  %v4256_v33 = vld [vmem:[%s5053_s4 + $0x234] sm:$0xf0]  ;;  %v3176_v40 = vor.u32 %v4224_v31, %v3175_v29  ;;  %v3113_v14 = vld [vmem:[%s5053_s4 + $0xb8] sm:$0xf0] }
  0x9c   : > { %1371 = vmatpush.bf16.msra.mxu2 %v3384_v39  ;;  %v3431_v35 = vld [vmem:[%s5053_s4 + $0x328] sm:$0xf]  ;;  %v4288_v36 = vld [vmem:[%s5053_s4 + $0x334] sm:$0xf0]  ;;  %v3304_v41 = vor.u32 %v4256_v33, %v3303_v32  ;;  %v4238_v15 = vld [vmem:[%s5053_s4 + $0x1ac] sm:$0xf] }
  0x9d   : > { %1385 = vmatpush.bf16.msra.mxu3 %v3512_v43  ;;  %v3031_v38 = vld [vmem:[%s5053_s4 + $0x8] sm:$0xf]  ;;  %v4188_v39 = vld [vmem:[%s5053_s4 + $0x14] sm:$0xf0]  ;;  %v3432_v45 = vor.u32 %v4288_v36, %v3431_v35  ;;  %v3241_v18 = vld [vmem:[%s5053_s4 + $0x1b8] sm:$0xf0] }
  0x9e   : > { %1344 = vmatpush.bf16.msra.mxu0 %v3112_v49  ;;  %v3159_v42 = vld [vmem:[%s5053_s4 + $0x108] sm:$0xf]  ;;  %v4220_v43 = vld [vmem:[%s5053_s4 + $0x114] sm:$0xf0]  ;;  %v4214_v49 = vld [vmem:[%s5053_s4 + $0xec] sm:$0xf]  ;;  %v3032_v52 = vor.u32 %v4188_v39, %v3031_v38 }
  0x9f   : > { %1358 = vmatpush.bf16.msra.mxu1 %v3240_v50  ;;  %v3287_v44 = vld [vmem:[%s5053_s4 + $0x208] sm:$0xf]  ;;  %v4252_v46 = vld [vmem:[%s5053_s4 + $0x214] sm:$0xf0]  ;;  %v3145_v50 = vld [vmem:[%s5053_s4 + $0xf8] sm:$0xf0]  ;;  %v3160_v56 = vor.u32 %v4220_v43, %v3159_v42 }
  0xa0   : > { %1372 = vmatpush.bf16.msra.mxu2 %v3368_v51  ;;  %v3415_v47 = vld [vmem:[%s5053_s4 + $0x308] sm:$0xf]  ;;  %v4284_v48 = vld [vmem:[%s5053_s4 + $0x314] sm:$0xf0]  ;;  %v4246_v51 = vld [vmem:[%s5053_s4 + $0x1ec] sm:$0xf]  ;;  %v3288_v57 = vor.u32 %v4252_v46, %v3287_v44 }
  0xa1   : > { %1386 = vmatpush.bf16.msra.mxu3 %v3496_v55  ;;  %v3401_v55 = vld [vmem:[%s5053_s4 + $0x2f8] sm:$0xf0]  ;;  %v3416_v60 = vor.u32 %v4284_v48, %v3415_v47  ;;  %v4270_v19 = vld [vmem:[%s5053_s4 + $0x2ac] sm:$0xf] }
  0xa2   : > { %1345 = vmatpush.bf16.msra.mxu0 %v3096_v61  ;;  %v3148_v61 = vor.u32 %v4214_v49, %v3145_v50  ;;  %v3369_v20 = vld [vmem:[%s5053_s4 + $0x2b8] sm:$0xf0]  ;;  %v4302_v21 = vld [vmem:[%s5053_s4 + $0x3ac] sm:$0xf] }
  0xa3   : > { %1359 = vmatpush.bf16.msra.mxu1 %v3224_v62  ;;  %v3276_v62 = vor.u32 %v4246_v51, %v3273_v53  ;;  %v3497_v22 = vld [vmem:[%s5053_s4 + $0x3b8] sm:$0xf0]  ;;  %v4202_v26 = vld [vmem:[%s5053_s4 + $0x8c] sm:$0xf] }
  0xa4   : > { %1373 = vmatpush.bf16.msra.mxu2 %v3352_v63  ;;  %v3404_v63 = vor.u32 %v4278_v54, %v3401_v55  ;;  %v3097_v28 = vld [vmem:[%s5053_s4 + $0x98] sm:$0xf0]  ;;  %v4234_v29 = vld [vmem:[%s5053_s4 + $0x18c] sm:$0xf] }
  0xa5   : > { %1387 = vmatpush.bf16.msra.mxu3 %v3480_v3  ;;  %v3532_v3 = vor.u32 %v4310_v58, %v3529_v59  ;;  %v3225_v31 = vld [vmem:[%s5053_s4 + $0x198] sm:$0xf0]  ;;  %v4266_v32 = vld [vmem:[%s5053_s4 + $0x28c] sm:$0xf] }
  0xa6   : > { %1346 = vmatpush.bf16.msra.mxu0 %v3080_v10  ;;  %v3132_v10 = vor.u32 %v4210_v0, %v3129_v1  ;;  %v3353_v33 = vld [vmem:[%s5053_s4 + $0x298] sm:$0xf0]  ;;  %v4298_v35 = vld [vmem:[%s5053_s4 + $0x38c] sm:$0xf]  ;;  %v3228_v38 = vor.u32 %v4234_v29, %v3225_v31 }
  0xa7   : > { %1360 = vmatpush.bf16.msra.mxu1 %v3208_v11  ;;  %v3260_v11 = vor.u32 %v4242_v2, %v3257_v4  ;;  %v3481_v36 = vld [vmem:[%s5053_s4 + $0x398] sm:$0xf0]  ;;  %v3356_v39 = vor.u32 %v4266_v32, %v3353_v33  ;;  %v4230_v42 = vld [vmem:[%s5053_s4 + $0x16c] sm:$0xf] }
  0xa8   : > { %1374 = vmatpush.bf16.msra.mxu2 %v3336_v12  ;;  %v3388_v12 = vor.u32 %v4274_v5, %v3385_v6  ;;  %v3484_v43 = vor.u32 %v4298_v35, %v3481_v36  ;;  %v3209_v44 = vld [vmem:[%s5053_s4 + $0x178] sm:$0xf0]  ;;  %v4294_v47 = vld [vmem:[%s5053_s4 + $0x36c] sm:$0xf]  ;;  %v430_v35 = vld [vmem:[#allocation2 + $0x30] sm:$0xff] }
  0xa9   : > { %1388 = vmatpush.bf16.msra.mxu3 %v3464_v17  ;;  %v3516_v17 = vor.u32 %v4306_v7, %v3513_v8  ;;  %v3337_v46 = vld [vmem:[%s5053_s4 + $0x278] sm:$0xf0]  ;;  %v3212_v50 = vor.u32 %v4230_v42, %v3209_v44  ;;  %v4226_v54 = vld [vmem:[%s5053_s4 + $0x14c] sm:$0xf] }
  0xaa   : > { %1347 = vmatpush.bf16.msra.mxu0 %v3064_v23  ;;  %v3116_v23 = vor.u32 %v4206_v13, %v3113_v14  ;;  %v3465_v48 = vld [vmem:[%s5053_s4 + $0x378] sm:$0xf0]  ;;  %v4290_v59 = vld [vmem:[%s5053_s4 + $0x34c] sm:$0xf] }
  0xab   : > { %1361 = vmatpush.bf16.msra.mxu1 %v3192_v24  ;;  %v3244_v24 = vor.u32 %v4238_v15, %v3241_v18  ;;  %v3065_v53 = vld [vmem:[%s5053_s4 + $0x58] sm:$0xf0]  ;;  %v3468_v55 = vor.u32 %v4294_v47, %v3465_v48  ;;  %v4190_v0 = vld [vmem:[%s5053_s4 + $0x2c] sm:$0xf] }
  0xac   : > { %1375 = vmatpush.bf16.msra.mxu2 %v3320_v25  ;;  %v3372_v25 = vor.u32 %v4270_v19, %v3369_v20  ;;  %v3321_v58 = vld [vmem:[%s5053_s4 + $0x258] sm:$0xf0]  ;;  %v4222_v2 = vld [vmem:[%s5053_s4 + $0x12c] sm:$0xf] }
  0xad   : > { %1389 = vmatpush.bf16.msra.mxu3 %v3448_v30  ;;  %v3500_v30 = vor.u32 %v4302_v21, %v3497_v22  ;;  %v3049_v1 = vld [vmem:[%s5053_s4 + $0x38] sm:$0xf0]  ;;  %v4254_v5 = vld [vmem:[%s5053_s4 + $0x22c] sm:$0xf] }
  0xae   : > { %1348 = vmatpush.bf16.msra.mxu0 %v3048_v37  ;;  %v3100_v37 = vor.u32 %v4202_v26, %v3097_v28  ;;  %v3177_v4 = vld [vmem:[%s5053_s4 + $0x138] sm:$0xf0]  ;;  %v4286_v7 = vld [vmem:[%s5053_s4 + $0x32c] sm:$0xf] }
  0xaf   : > { %1362 = vmatpush.bf16.msra.mxu1 %v3176_v40  ;;  %v4198_v40 = vld [vmem:[%s5053_s4 + $0x6c] sm:$0xf]  ;;  %v3305_v6 = vld [vmem:[%s5053_s4 + $0x238] sm:$0xf0] }
  0xb0   : > { %1376 = vmatpush.bf16.msra.mxu2 %v3304_v41  ;;  %v3081_v41 = vld [vmem:[%s5053_s4 + $0x78] sm:$0xf0]  ;;  %v4186_v13 = vld [vmem:[%s5053_s4 + $0xc] sm:$0xf] }
  0xb1   : > { %1390 = vmatpush.bf16.msra.mxu3 %v3432_v45  ;;  %v4262_v45 = vld [vmem:[%s5053_s4 + $0x26c] sm:$0xf]  ;;  %v3084_v49 = vor.u32 %v4198_v40, %v3081_v41  ;;  %v3433_v8 = vld [vmem:[%s5053_s4 + $0x338] sm:$0xf0] }
  0xb2   : > { %1349 = vmatpush.bf16.msra.mxu0 %v3032_v52  ;;  %v3340_v51 = vor.u32 %v4262_v45, %v3337_v46  ;;  %v4194_v52 = vld [vmem:[%s5053_s4 + $0x4c] sm:$0xf]  ;;  %v3033_v14 = vld [vmem:[%s5053_s4 + $0x18] sm:$0xf0] }
  0xb3   : > { %1363 = vmatpush.bf16.msra.mxu1 %v3160_v56  ;;  %v3193_v56 = vld [vmem:[%s5053_s4 + $0x158] sm:$0xf0]  ;;  %v4218_v15 = vld [vmem:[%s5053_s4 + $0x10c] sm:$0xf] }
  0xb4   : > { %1377 = vmatpush.bf16.msra.mxu2 %v3288_v57  ;;  %v4258_v57 = vld [vmem:[%s5053_s4 + $0x24c] sm:$0xf]  ;;  %v3161_v18 = vld [vmem:[%s5053_s4 + $0x118] sm:$0xf0] }
  0xb5   : > { %1391 = vmatpush.bf16.msra.mxu3 %v3416_v60  ;;  %1350 = vmatmul.bf16.vlgmr.msra.gmra.mxu0 %v5183_v27  ;;  %v3449_v60 = vld [vmem:[%s5053_s4 + $0x358] sm:$0xf0]  ;;  %v4250_v19 = vld [vmem:[%s5053_s4 + $0x20c] sm:$0xf] }
  0xb6   : > { %1398 = vmatpush.bf16.msrb.mxu0 %v3148_v61  ;;  %1364 = vmatmul.bf16.vlgmr.msra.gmra.mxu1 %v5190_v34  ;;  %v3068_v61 = vor.u32 %v4194_v52, %v3065_v53  ;;  %v3289_v20 = vld [vmem:[%s5053_s4 + $0x218] sm:$0xf0]  ;;  %v4282_v21 = vld [vmem:[%s5053_s4 + $0x30c] sm:$0xf] }
  0xb7   : > { %1412 = vmatpush.bf16.msrb.mxu1 %v3276_v62  ;;  %1378 = vmatmul.bf16.vlgmr.msra.gmra.mxu2 %v5165_v9  ;;  %v3196_v62 = vor.u32 %v4226_v54, %v3193_v56  ;;  %v3417_v22 = vld [vmem:[%s5053_s4 + $0x318] sm:$0xf0]  ;;  %v434_v42 = vld [vmem:[#allocation2 + $0x8] sm:$0xff] }
  0xb8   : > { %1426 = vmatpush.bf16.msrb.mxu2 %v3404_v63  ;;  %1392 = vmatmul.bf16.vlgmr.msra.gmra.mxu3 %v5172_v16  ;;  %v3324_v63 = vor.u32 %v4258_v57, %v3321_v58  ;;  %v3420_v26 = vor.u32 %v4282_v21, %v3417_v22  ;;  %v435_v58 = vld [vmem:[#allocation2 + $0x20] sm:$0xff] }
  0xb9   : > { %1440 = vmatpush.bf16.msrb.mxu3 %v3532_v3  ;;  %v3452_v3 = vor.u32 %v4290_v59, %v3449_v60 }
  0xba   : > { %1399 = vmatpush.bf16.msrb.mxu0 %v3132_v10  ;;  %v3052_v10 = vor.u32 %v4190_v0, %v3049_v1 }
  0xbb   : > { %1413 = vmatpush.bf16.msrb.mxu1 %v3260_v11  ;;  %v3180_v11 = vor.u32 %v4222_v2, %v3177_v4 }
  0xbc   : > { %1427 = vmatpush.bf16.msrb.mxu2 %v3388_v12  ;;  %v3308_v12 = vor.u32 %v4254_v5, %v3305_v6 }
  0xbd   : > { %1441 = vmatpush.bf16.msrb.mxu3 %v3516_v17  ;;  %v3436_v17 = vor.u32 %v4286_v7, %v3433_v8 }
  0xbe   : > { %1400 = vmatpush.bf16.msrb.mxu0 %v3116_v23  ;;  %v3036_v23 = vor.u32 %v4186_v13, %v3033_v14  ;;  %v436_v13 = vld [vmem:[#allocation2 + $0x28] sm:$0xff] }
  0xbf   : > { %1414 = vmatpush.bf16.msrb.mxu1 %v3244_v24  ;;  %v3164_v24 = vor.u32 %v4218_v15, %v3161_v18 }
  0xc0   : > { %1428 = vmatpush.bf16.msrb.mxu2 %v3372_v25  ;;  %v3292_v25 = vor.u32 %v4250_v19, %v3289_v20 }
  0xc1   : > { %1442 = vmatpush.bf16.msrb.mxu3 %v3500_v30 }
  0xc2   : > { %1401 = vmatpush.bf16.msrb.mxu0 %v3100_v37 }
  0xc3   : > { %1415 = vmatpush.bf16.msrb.mxu1 %v3228_v38 }
  0xc4   : > { %1429 = vmatpush.bf16.msrb.mxu2 %v3356_v39 }
  0xc5   : > { %1443 = vmatpush.bf16.msrb.mxu3 %v3484_v43 }
  0xc6   : > { %1402 = vmatpush.bf16.msrb.mxu0 %v3084_v49  ;;  %v431_v49 = vld [vmem:[#allocation2] sm:$0xff] }
  0xc7   : > { %1416 = vmatpush.bf16.msrb.mxu1 %v3212_v50 }
  0xc8   : > { %1430 = vmatpush.bf16.msrb.mxu2 %v3340_v51 }
  0xc9   : > { %1444 = vmatpush.bf16.msrb.mxu3 %v3468_v55 }
  0xca   : > { %1403 = vmatpush.bf16.msrb.mxu0 %v3068_v61 }
  0xcb   : > { %1417 = vmatpush.bf16.msrb.mxu1 %v3196_v62 }
  0xcc   : > { %1431 = vmatpush.bf16.msrb.mxu2 %v3324_v63 }
  0xcd   : > { %1445 = vmatpush.bf16.msrb.mxu3 %v3452_v3  ;;  %v432_v3 = vld [vmem:[#allocation2 + $0x18] sm:$0xff] }
  0xce   : > { %1404 = vmatpush.bf16.msrb.mxu0 %v3052_v10 }
  0xcf   : > { %1418 = vmatpush.bf16.msrb.mxu1 %v3180_v11 }
  0xd0   : > { %1432 = vmatpush.bf16.msrb.mxu2 %v3308_v12 }
  0xd1   : > { %1446 = vmatpush.bf16.msrb.mxu3 %v3436_v17 }
  0xd2   : > { %1405 = vmatpush.bf16.msrb.mxu0 %v3036_v23  ;;  %v433_v23 = vld [vmem:[#allocation2 + $0x10] sm:$0xff] }
  0xd3   : > { %1419 = vmatpush.bf16.msrb.mxu1 %v3164_v24 }
  0xd4   : > { %1433 = vmatpush.bf16.msrb.mxu2 %v3292_v25 }
  0xd5   : > { %1447 = vmatpush.bf16.msrb.mxu3 %v3420_v26  ;;  %1406 = vmatmul.bf16.vlgmr.msrb.gmra.mxu0 %v5183_v27 }
  0xd6   : > { %1420 = vmatmul.bf16.vlgmr.msrb.gmra.mxu1 %v5190_v34 }
  0xd7   : > { %1434 = vmatmul.bf16.vlgmr.msrb.gmra.mxu2 %v5165_v9 }
  0xd8   : > { %1448 = vmatmul.bf16.vlgmr.msrb.gmra.mxu3 %v5172_v16 }
  0xf8   : > { %v1239_v28 = vpop.f32.mrf.mxu0 }
  0xfa   : > { %v1253_v29 = vpop.f32.mrf.mxu1  ;;  %v1267_v31 = vpop.f32.mrf.mxu2 }
  0xfb   : > { %v1254_v30 = vadd.f32 %v1253_v29, %v1239_v28 }
  0xfd   : > { %v1281_v32 = vpop.f32.mrf.mxu3  ;;  %v1268_v33 = vadd.f32 %v1267_v31, %v1254_v30 }
  0xff   : > { %v1282_v36 = vadd.f32 %v1281_v32, %v1268_v33  ;;  %v437_v32 = vld [vmem:[#allocation2 + $0x38] sm:$0xff] }
 0x100   : > { %v1241_v38 = vpop.f32.mrf.mxu0 }
 0x101   : > { %v1454_v37 = vadd.f32 %v1282_v36, %v430_v35 }
 0x102   : > { %v1255_v39 = vpop.f32.mrf.mxu1  ;;  %v1269_v27 = vpop.f32.mrf.mxu2 }
 0x103   : > { %1462 = vst [vmem:[#allocation2 + $0x30] sm:$0xff] %v1454_v37  ;;  %v1256_v40 = vadd.f32 %v1255_v39, %v1241_v38 }
 0x105   : > { %v1283_v41 = vpop.f32.mrf.mxu3  ;;  %v1270_v34 = vadd.f32 %v1269_v27, %v1256_v40 }
 0x107   : > { %v1284_v9 = vadd.f32 %v1283_v41, %v1270_v34 }
 0x109   : > { %v1458_v43 = vadd.f32 %v1284_v9, %v434_v42 }
 0x10b   : > { %1466 = vst [vmem:[#allocation2 + $0x8] sm:$0xff] %v1458_v43 }
 0x112   : > { %v1295_v16 = vpop.f32.mrf.mxu0 }
 0x113   : > { %v1309_v44 = vpop.f32.mrf.mxu1 }
 0x114   : > { %v1310_v45 = vadd.f32 %v1309_v44, %v1295_v16 }
 0x11a   : > { %v1323_v46 = vpop.f32.mrf.mxu2  ;;  %v1297_v51 = vpop.f32.mrf.mxu0 }
 0x11b   : > { %v1324_v47 = vadd.f32 %v1323_v46, %v1310_v45  ;;  %v1337_v48 = vpop.f32.mrf.mxu3  ;;  %v1311_v52 = vpop.f32.mrf.mxu1 }
 0x11c   : > { %v1312_v54 = vadd.f32 %v1311_v52, %v1297_v51 }
 0x11d   : > { %v1338_v50 = vadd.f32 %v1337_v48, %v1324_v47 }
 0x11f   : > { %v1455_v53 = vadd.f32 %v1338_v50, %v431_v49 }
 0x121   : > { %1463 = vst [vmem:[#allocation2] sm:$0xff] %v1455_v53 }
 0x122   : > { %v1325_v55 = vpop.f32.mrf.mxu2 }
 0x123   : > { %v1326_v56 = vadd.f32 %v1325_v55, %v1312_v54  ;;  %v1339_v57 = vpop.f32.mrf.mxu3 }
 0x125   : > { %v1340_v59 = vadd.f32 %v1339_v57, %v1326_v56 }
 0x127   : > { %v1459_v60 = vadd.f32 %v1340_v59, %v435_v58 }
 0x129   : > { %1467 = vst [vmem:[#allocation2 + $0x20] sm:$0xff] %v1459_v60 }
 0x132   : > { %v1351_v61 = vpop.f32.mrf.mxu0 }
 0x133   : > { %v1365_v62 = vpop.f32.mrf.mxu1 }
 0x134   : > { %v1366_v63 = vadd.f32 %v1365_v62, %v1351_v61 }
 0x13a   : > { %v1379_v0 = vpop.f32.mrf.mxu2  ;;  %v1353_v5 = vpop.f32.mrf.mxu0 }
 0x13b   : > { %v1380_v1 = vadd.f32 %v1379_v0, %v1366_v63  ;;  %v1393_v2 = vpop.f32.mrf.mxu3  ;;  %v1367_v6 = vpop.f32.mrf.mxu1 }
 0x13c   : > { %v1368_v8 = vadd.f32 %v1367_v6, %v1353_v5 }
 0x13d   : > { %v1394_v4 = vadd.f32 %v1393_v2, %v1380_v1 }
 0x13f   : > { %v1456_v7 = vadd.f32 %v1394_v4, %v432_v3 }
 0x141   : > { %1464 = vst [vmem:[#allocation2 + $0x18] sm:$0xff] %v1456_v7 }
 0x142   : > { %v1381_v10 = vpop.f32.mrf.mxu2 }
 0x143   : > { %v1382_v11 = vadd.f32 %v1381_v10, %v1368_v8  ;;  %v1395_v12 = vpop.f32.mrf.mxu3 }
 0x145   : > { %v1396_v14 = vadd.f32 %v1395_v12, %v1382_v11 }
 0x147   : > { %v1460_v15 = vadd.f32 %v1396_v14, %v436_v13 }
 0x149   : > { %1468 = vst [vmem:[#allocation2 + $0x28] sm:$0xff] %v1460_v15 }
 0x152   : > { %v1407_v17 = vpop.f32.mrf.mxu0 }
 0x153   : > { %v1421_v18 = vpop.f32.mrf.mxu1 }
 0x154   : > { %v1422_v19 = vadd.f32 %v1421_v18, %v1407_v17 }
 0x15a   : > { %v1435_v20 = vpop.f32.mrf.mxu2  ;;  %v1409_v25 = vpop.f32.mrf.mxu0 }
 0x15b   : > { %v1436_v21 = vadd.f32 %v1435_v20, %v1422_v19  ;;  %v1449_v22 = vpop.f32.mrf.mxu3  ;;  %v1423_v26 = vpop.f32.mrf.mxu1 }
 0x15c   : > { %v1424_v29 = vadd.f32 %v1423_v26, %v1409_v25 }
 0x15d   : > { %v1450_v24 = vadd.f32 %v1449_v22, %v1436_v21 }
 0x15f   : > { %v1457_v28 = vadd.f32 %v1450_v24, %v433_v23 }
 0x161   : > { %1465 = vst [vmem:[#allocation2 + $0x10] sm:$0xff] %v1457_v28 }
 0x162   : > { %v1437_v30 = vpop.f32.mrf.mxu2 }
 0x163   : > { %v1438_v31 = vadd.f32 %v1437_v30, %v1424_v29  ;;  %v1451_v33 = vpop.f32.mrf.mxu3 }
 0x165   : > { %v1452_v35 = vadd.f32 %v1451_v33, %v1438_v31  ;;  %1473 = sbr.rel (%p3533_p1) target bundleno = 785 (0x311), region = 80 }
 0x167   : > { %v1461_v36 = vadd.f32 %v1452_v35, %v437_v32 }
 0x169   : > { %1469 = vst [vmem:[#allocation2 + $0x38] sm:$0xff] %v1461_v36 }
 0x16a   : > { %v3648_v37 = vld [vmem:[#allocation9 + $0xe0] sm:$0xf]  ;;  %v4343_v38 = vld [vmem:[#allocation9 + $0xec] sm:$0xf0] }
 0x16b   : > { %v3776_v39 = vld [vmem:[#allocation9 + $0x1e0] sm:$0xf]  ;;  %v3649_v40 = vor.u32 %v4343_v38, %v3648_v37  ;;  %v4375_v27 = vld [vmem:[#allocation9 + $0x1ec] sm:$0xf0] }
 0x16c   : > { %v3904_v41 = vld [vmem:[#allocation9 + $0x2e0] sm:$0xf]  ;;  %v4407_v34 = vld [vmem:[#allocation9 + $0x2ec] sm:$0xf0]  ;;  %v3777_v42 = vor.u32 %v4375_v27, %v3776_v39 }
 0x16d   : > { %v3905_v9 = vor.u32 %v4407_v34, %v3904_v41  ;;  %v4032_v43 = vld [vmem:[#allocation9 + $0x3e0] sm:$0xf]  ;;  %v4439_v16 = vld [vmem:[#allocation9 + $0x3ec] sm:$0xf0]  ;;  %2291 = vmatpush.bf16.msra.mxu0 %v3649_v40 }
 0x16e   : > { %v3632_v44 = vld [vmem:[#allocation9 + $0xc0] sm:$0xf]  ;;  %v4033_v45 = vor.u32 %v4439_v16, %v4032_v43  ;;  %v4339_v46 = vld [vmem:[#allocation9 + $0xcc] sm:$0xf0]  ;;  %2305 = vmatpush.bf16.msra.mxu1 %v3777_v42 }
 0x16f   : > { %v3760_v47 = vld [vmem:[#allocation9 + $0x1c0] sm:$0xf]  ;;  %v4371_v48 = vld [vmem:[#allocation9 + $0x1cc] sm:$0xf0]  ;;  %2319 = vmatpush.bf16.msra.mxu2 %v3905_v9  ;;  %v3633_v49 = vor.u32 %v4339_v46, %v3632_v44 }
 0x170   : > { %v3761_v50 = vor.u32 %v4371_v48, %v3760_v47  ;;  %v3888_v51 = vld [vmem:[#allocation9 + $0x2c0] sm:$0xf]  ;;  %v4403_v52 = vld [vmem:[#allocation9 + $0x2cc] sm:$0xf0]  ;;  %2333 = vmatpush.bf16.msra.mxu3 %v4033_v45 }
 0x171   : > { %v4016_v53 = vld [vmem:[#allocation9 + $0x3c0] sm:$0xf]  ;;  %v3889_v54 = vor.u32 %v4403_v52, %v3888_v51  ;;  %v4435_v55 = vld [vmem:[#allocation9 + $0x3cc] sm:$0xf0]  ;;  %2292 = vmatpush.bf16.msra.mxu0 %v3633_v49 }
 0x172   : > { %v3616_v56 = vld [vmem:[#allocation9 + $0xa0] sm:$0xf]  ;;  %v4335_v57 = vld [vmem:[#allocation9 + $0xac] sm:$0xf0]  ;;  %v4017_v58 = vor.u32 %v4435_v55, %v4016_v53  ;;  %2306 = vmatpush.bf16.msra.mxu1 %v3761_v50 }
 0x173   : > { %v3744_v59 = vld [vmem:[#allocation9 + $0x1a0] sm:$0xf]  ;;  %v4367_v60 = vld [vmem:[#allocation9 + $0x1ac] sm:$0xf0]  ;;  %v3617_v62 = vor.u32 %v4335_v57, %v3616_v56  ;;  %2320 = vmatpush.bf16.msra.mxu2 %v3889_v54 }
 0x174   : > { %v3872_v61 = vld [vmem:[#allocation9 + $0x2a0] sm:$0xf]  ;;  %v4399_v63 = vld [vmem:[#allocation9 + $0x2ac] sm:$0xf0]  ;;  %v3745_v2 = vor.u32 %v4367_v60, %v3744_v59  ;;  %2334 = vmatpush.bf16.msra.mxu3 %v4017_v58 }
 0x175   : > { %v4000_v0 = vld [vmem:[#allocation9 + $0x3a0] sm:$0xf]  ;;  %v4431_v1 = vld [vmem:[#allocation9 + $0x3ac] sm:$0xf0]  ;;  %v3873_v3 = vor.u32 %v4399_v63, %v3872_v61  ;;  %2293 = vmatpush.bf16.msra.mxu0 %v3617_v62  ;;  %v4341_v61 = vld [vmem:[#allocation9 + $0xe4] sm:$0xf] }
 0x176   : > { %v3600_v4 = vld [vmem:[#allocation9 + $0x80] sm:$0xf]  ;;  %v4331_v5 = vld [vmem:[#allocation9 + $0x8c] sm:$0xf0]  ;;  %v4001_v7 = vor.u32 %v4431_v1, %v4000_v0  ;;  %2307 = vmatpush.bf16.msra.mxu1 %v3745_v2  ;;  %v3650_v62 = vld [vmem:[#allocation9 + $0xf0] sm:$0xf0] }
 0x177   : > { %v3728_v6 = vld [vmem:[#allocation9 + $0x180] sm:$0xf]  ;;  %v4363_v8 = vld [vmem:[#allocation9 + $0x18c] sm:$0xf0]  ;;  %v3601_v14 = vor.u32 %v4331_v5, %v3600_v4  ;;  %2321 = vmatpush.bf16.msra.mxu2 %v3873_v3  ;;  %v4373_v63 = vld [vmem:[#allocation9 + $0x1e4] sm:$0xf] }
 0x178   : > { %v3856_v10 = vld [vmem:[#allocation9 + $0x280] sm:$0xf]  ;;  %v4395_v11 = vld [vmem:[#allocation9 + $0x28c] sm:$0xf0]  ;;  %v3729_v15 = vor.u32 %v4363_v8, %v3728_v6  ;;  %2335 = vmatpush.bf16.msra.mxu3 %v4001_v7  ;;  %v3778_v0 = vld [vmem:[#allocation9 + $0x1f0] sm:$0xf0] }
 0x179   : > { %v3984_v12 = vld [vmem:[#allocation9 + $0x380] sm:$0xf]  ;;  %v4427_v13 = vld [vmem:[#allocation9 + $0x38c] sm:$0xf0]  ;;  %v3857_v17 = vor.u32 %v4395_v11, %v3856_v10  ;;  %2294 = vmatpush.bf16.msra.mxu0 %v3601_v14  ;;  %v4405_v2 = vld [vmem:[#allocation9 + $0x2e4] sm:$0xf] }
 0x17a   : > { %v3584_v18 = vld [vmem:[#allocation9 + $0x60] sm:$0xf]  ;;  %v4327_v19 = vld [vmem:[#allocation9 + $0x6c] sm:$0xf0]  ;;  %v3985_v21 = vor.u32 %v4427_v13, %v3984_v12  ;;  %2308 = vmatpush.bf16.msra.mxu1 %v3729_v15  ;;  %v3906_v3 = vld [vmem:[#allocation9 + $0x2f0] sm:$0xf0]  ;;  %v3653_v12 = vor.u32 %v4341_v61, %v3650_v62 }
 0x17b   : > { %v3712_v20 = vld [vmem:[#allocation9 + $0x160] sm:$0xf]  ;;  %v4359_v22 = vld [vmem:[#allocation9 + $0x16c] sm:$0xf0]  ;;  %v3585_v28 = vor.u32 %v4327_v19, %v3584_v18  ;;  %2322 = vmatpush.bf16.msra.mxu2 %v3857_v17  ;;  %v4437_v4 = vld [vmem:[#allocation9 + $0x3e4] sm:$0xf]  ;;  %v3781_v17 = vor.u32 %v4373_v63, %v3778_v0  ;;  %v3909_v18 = vor.u32 %v4405_v2, %v3906_v3 }
 0x17c   : > { %v3840_v23 = vld [vmem:[#allocation9 + $0x260] sm:$0xf]  ;;  %v4391_v24 = vld [vmem:[#allocation9 + $0x26c] sm:$0xf0]  ;;  %v3713_v29 = vor.u32 %v4359_v22, %v3712_v20  ;;  %2336 = vmatpush.bf16.msra.mxu3 %v3985_v21  ;;  %v4034_v7 = vld [vmem:[#allocation9 + $0x3f0] sm:$0xf0] }
 0x17d   : > { %v3968_v25 = vld [vmem:[#allocation9 + $0x360] sm:$0xf]  ;;  %v4423_v26 = vld [vmem:[#allocation9 + $0x36c] sm:$0xf0]  ;;  %v3841_v30 = vor.u32 %v4391_v24, %v3840_v23  ;;  %2295 = vmatpush.bf16.msra.mxu0 %v3585_v28  ;;  %v4337_v8 = vld [vmem:[#allocation9 + $0xc4] sm:$0xf]  ;;  %v4037_v22 = vor.u32 %v4437_v4, %v4034_v7 }
 0x17e   : > { %v3568_v31 = vld [vmem:[#allocation9 + $0x40] sm:$0xf]  ;;  %v4323_v32 = vld [vmem:[#allocation9 + $0x4c] sm:$0xf0]  ;;  %v3969_v35 = vor.u32 %v4423_v26, %v3968_v25  ;;  %2309 = vmatpush.bf16.msra.mxu1 %v3713_v29  ;;  %v3634_v10 = vld [vmem:[#allocation9 + $0xd0] sm:$0xf0] }
 0x17f   : > { %v3696_v33 = vld [vmem:[#allocation9 + $0x140] sm:$0xf]  ;;  %v4355_v36 = vld [vmem:[#allocation9 + $0x14c] sm:$0xf0]  ;;  %v3569_v27 = vor.u32 %v4323_v32, %v3568_v31  ;;  %2323 = vmatpush.bf16.msra.mxu2 %v3841_v30  ;;  %v4369_v13 = vld [vmem:[#allocation9 + $0x1c4] sm:$0xf]  ;;  %v3637_v31 = vor.u32 %v4337_v8, %v3634_v10 }
 0x180   : > { %v3824_v37 = vld [vmem:[#allocation9 + $0x240] sm:$0xf]  ;;  %v4387_v38 = vld [vmem:[#allocation9 + $0x24c] sm:$0xf0]  ;;  %v3697_v41 = vor.u32 %v4355_v36, %v3696_v33  ;;  %2337 = vmatpush.bf16.msra.mxu3 %v3969_v35  ;;  %v3762_v14 = vld [vmem:[#allocation9 + $0x1d0] sm:$0xf0] }
 0x181   : > { %v3952_v39 = vld [vmem:[#allocation9 + $0x340] sm:$0xf]  ;;  %v4419_v40 = vld [vmem:[#allocation9 + $0x34c] sm:$0xf0]  ;;  %v3825_v34 = vor.u32 %v4387_v38, %v3824_v37  ;;  %2296 = vmatpush.bf16.msra.mxu0 %v3569_v27  ;;  %v4401_v15 = vld [vmem:[#allocation9 + $0x2c4] sm:$0xf] }
 0x182   : > { %v3552_v42 = vld [vmem:[#allocation9 + $0x20] sm:$0xf]  ;;  %v4319_v9 = vld [vmem:[#allocation9 + $0x2c] sm:$0xf0]  ;;  %v3953_v16 = vor.u32 %v4419_v40, %v3952_v39  ;;  %2310 = vmatpush.bf16.msra.mxu1 %v3697_v41  ;;  %v3890_v19 = vld [vmem:[#allocation9 + $0x2d0] sm:$0xf0]  ;;  %v3765_v39 = vor.u32 %v4369_v13, %v3762_v14 }
 0x183   : > { %v3680_v43 = vld [vmem:[#allocation9 + $0x120] sm:$0xf]  ;;  %v4351_v44 = vld [vmem:[#allocation9 + $0x12c] sm:$0xf0]  ;;  %v3553_v49 = vor.u32 %v4319_v9, %v3552_v42  ;;  %2324 = vmatpush.bf16.msra.mxu2 %v3825_v34  ;;  %v4433_v20 = vld [vmem:[#allocation9 + $0x3c4] sm:$0xf]  ;;  %v3893_v40 = vor.u32 %v4401_v15, %v3890_v19 }
 0x184   : > { %v3808_v45 = vld [vmem:[#allocation9 + $0x220] sm:$0xf]  ;;  %v4383_v46 = vld [vmem:[#allocation9 + $0x22c] sm:$0xf0]  ;;  %v3681_v53 = vor.u32 %v4351_v44, %v3680_v43  ;;  %2338 = vmatpush.bf16.msra.mxu3 %v3953_v16  ;;  %v4018_v21 = vld [vmem:[#allocation9 + $0x3d0] sm:$0xf0] }
 0x185   : > { %v3936_v47 = vld [vmem:[#allocation9 + $0x320] sm:$0xf]  ;;  %v4415_v48 = vld [vmem:[#allocation9 + $0x32c] sm:$0xf0]  ;;  %v3809_v54 = vor.u32 %v4383_v46, %v3808_v45  ;;  %2297 = vmatpush.bf16.msra.mxu0 %v3553_v49  ;;  %v5361_v23 = vld [vmem:[#allocation9 + $0xa4] sm:$0xf]  ;;  %v4021_v27 = vor.u32 %v4433_v20, %v4018_v21 }
 0x186   : > { %v3536_v50 = vld [vmem:[#allocation9] sm:$0xf]  ;;  %v4315_v51 = vld [vmem:[#allocation9 + $0xc] sm:$0xf0]  ;;  %v3937_v58 = vor.u32 %v4415_v48, %v3936_v47  ;;  %2311 = vmatpush.bf16.msra.mxu1 %v3681_v53  ;;  %v5363_v24 = vld [vmem:[#allocation9 + $0xb0] sm:$0xf0] }
 0x187   : > { %v3664_v52 = vld [vmem:[#allocation9 + $0x100] sm:$0xf]  ;;  %v4347_v55 = vld [vmem:[#allocation9 + $0x10c] sm:$0xf0]  ;;  %v3537_v1 = vor.u32 %v4315_v51, %v3536_v50  ;;  %2325 = vmatpush.bf16.msra.mxu2 %v3809_v54  ;;  %v5365_v25 = vld [vmem:[#allocation9 + $0x1a4] sm:$0xf]  ;;  %v3621_v48 = vor.u32 %v5361_v23, %v5363_v24 }
 0x188   : > { %v3792_v56 = vld [vmem:[#allocation9 + $0x200] sm:$0xf]  ;;  %v4379_v57 = vld [vmem:[#allocation9 + $0x20c] sm:$0xf0]  ;;  %v3665_v5 = vor.u32 %v4347_v55, %v3664_v52  ;;  %2339 = vmatpush.bf16.msra.mxu3 %v3937_v58  ;;  %v5367_v26 = vld [vmem:[#allocation9 + $0x1b0] sm:$0xf0] }
 0x189   : > { %v3920_v59 = vld [vmem:[#allocation9 + $0x300] sm:$0xf]  ;;  %v4411_v60 = vld [vmem:[#allocation9 + $0x30c] sm:$0xf0]  ;;  %v3793_v6 = vor.u32 %v4379_v57, %v3792_v56  ;;  %2298 = vmatpush.bf16.msra.mxu0 %v3537_v1  ;;  %v1474_v28 = vld [vmem:[#allocation8] sm:$0xf]  ;;  %v3749_v49 = vor.u32 %v5365_v25, %v5367_v26 }
 0x18a   : > { %v3921_v11 = vor.u32 %v4411_v60, %v3920_v59  ;;  %2312 = vmatpush.bf16.msra.mxu1 %v3665_v5  ;;  %v1479_v29 = vld [vmem:[#allocation2 + $0x18] sm:$0xff]  ;;  %v1483_v30 = vld [vmem:[#allocation2 + $0x28] sm:$0xff]  ;;  %v1488_v32 = vperm.slane %v1474_v28, 2  ;;  %v1477_v33 = vld [vmem:[#allocation2 + $0x30] sm:$0xff]  ;;  %v1486_v36 = vperm.slane %v1474_v28, 0  ;;  %v1489_v38 = vperm.slane %v1474_v28, 3 }
 0x18b   : > { %2326 = vmatpush.bf16.msra.mxu2 %v3793_v6  ;;  %v1481_v35 = vld [vmem:[#allocation2 + $0x8] sm:$0xff]  ;;  %v1480_v37 = vld [vmem:[#allocation2 + $0x10] sm:$0xff]  ;;  %v1484_v34 = vld [vmem:[#allocation2 + $0x38] sm:$0xff]  ;;  %v1487_v42 = vperm.slane %v1474_v28, 1 }
 0x18c   : > { %2340 = vmatpush.bf16.msra.mxu3 %v3921_v11  ;;  %v4397_v41 = vld [vmem:[#allocation9 + $0x2a4] sm:$0xf]  ;;  %v3874_v9 = vld [vmem:[#allocation9 + $0x2b0] sm:$0xf0]  ;;  %v1496_v44 = vadd.f32 %v1488_v32, %v1479_v29  ;;  %v1500_v45 = vadd.f32 %v1488_v32, %v1483_v30  ;;  %v1494_v46 = vadd.f32 %v1486_v36, %v1477_v33  ;;  %v1498_v47 = vadd.f32 %v1486_v36, %v1481_v35  ;;  %v1478_v57 = vld [vmem:[#allocation2] sm:$0xff] }
 0x18d   : > { %2347 = vmatpush.bf16.msrb.mxu0 %v3653_v12  ;;  %v4429_v43 = vld [vmem:[#allocation9 + $0x3a4] sm:$0xf]  ;;  %v4002_v16 = vld [vmem:[#allocation9 + $0x3b0] sm:$0xf0]  ;;  %v1497_v51 = vadd.f32 %v1489_v38, %v1480_v37  ;;  %v1501_v52 = vadd.f32 %v1489_v38, %v1484_v34  ;;  %v1482_v58 = vld [vmem:[#allocation2 + $0x20] sm:$0xff]  ;;  %v3877_v59 = vor.u32 %v4397_v41, %v3874_v9  ;;  %v1495_v6 = vadd.f32 %v1487_v42, %v1478_v57 }
 0x18e   : > { %2361 = vmatpush.bf16.msrb.mxu1 %v3781_v17  ;;  %v4329_v50 = vld [vmem:[#allocation9 + $0x84] sm:$0xf]  ;;  %v1504_v53 = vmax.f32 %v1496_v44, 0.0  ;;  %v1508_v54 = vmax.f32 %v1500_v45, 0.0  ;;  %v1502_v55 = vmax.f32 %v1494_v46, 0.0  ;;  %v1506_v56 = vmax.f32 %v1498_v47, 0.0 }
 0x18f   : > { %2375 = vmatpush.bf16.msrb.mxu2 %v3909_v18  ;;  %v4005_v60 = vor.u32 %v4429_v43, %v4002_v16  ;;  %v3602_v61 = vld [vmem:[#allocation9 + $0x90] sm:$0xf0]  ;;  %v4361_v62 = vld [vmem:[#allocation9 + $0x184] sm:$0xf]  ;;  %v1505_v63 = vmax.f32 %v1497_v51, 0.0  ;;  %v1509_v0 = vmax.f32 %v1501_v52, 0.0  ;;  %v1499_v7 = vadd.f32 %v1487_v42, %v1482_v58 }
 0x190   : > { %2389 = vmatpush.bf16.msrb.mxu3 %v4037_v22  ;;  %v3730_v1 = vld [vmem:[#allocation9 + $0x190] sm:$0xf0]  ;;  %v4393_v2 = vld [vmem:[#allocation9 + $0x284] sm:$0xf]  ;;  %v5373_v4 = vpack.c.bf16 %v1508_v54, %v1504_v53  ;;  %v5375_v5 = vpack.c.bf16 %v1506_v56, %v1502_v55  ;;  %v3605_v12 = vor.u32 %v4329_v50, %v3602_v61  ;;  %v1503_v13 = vmax.f32 %v1495_v6, 0.0 }
 0x191   : > { %2348 = vmatpush.bf16.msrb.mxu0 %v3637_v31  ;;  %v3858_v3 = vld [vmem:[#allocation9 + $0x290] sm:$0xf0]  ;;  %v4425_v8 = vld [vmem:[#allocation9 + $0x384] sm:$0xf]  ;;  %v5377_v11 = vpack.c.bf16 %v1509_v0, %v1505_v63  ;;  %v1507_v14 = vmax.f32 %v1499_v7, 0.0  ;;  %v3733_v15 = vor.u32 %v4361_v62, %v3730_v1 }
 0x192   : > { %2362 = vmatpush.bf16.msrb.mxu1 %v3765_v39  ;;  %v3986_v10 = vld [vmem:[#allocation9 + $0x390] sm:$0xf0]  ;;  %2327 = vmatmul.bf16.vlgmr.msra.gmra.mxu2 %v5373_v4  ;;  %v3861_v17 = vor.u32 %v4393_v2, %v3858_v3  ;;  %v4325_v18 = vld [vmem:[#allocation9 + $0x64] sm:$0xf]  ;;  %v3656_v62 = vld [vmem:[#allocation9 + $0xe8] sm:$0xf] }
 0x193   : > { %2376 = vmatpush.bf16.msrb.mxu2 %v3893_v40  ;;  %v3586_v19 = vld [vmem:[#allocation9 + $0x70] sm:$0xf0]  ;;  %v4357_v20 = vld [vmem:[#allocation9 + $0x164] sm:$0xf]  ;;  %v3989_v21 = vor.u32 %v4425_v8, %v3986_v10  ;;  %2299 = vmatmul.bf16.vlgmr.msra.gmra.mxu0 %v5375_v5  ;;  %v5381_v25 = vpack.c.bf16 %v1507_v14, %v1503_v13  ;;  %v4344_v63 = vld [vmem:[#allocation9 + $0xf4] sm:$0xf0] }
 0x194   : > { %2390 = vmatpush.bf16.msrb.mxu3 %v4021_v27  ;;  %v3714_v22 = vld [vmem:[#allocation9 + $0x170] sm:$0xf0]  ;;  %v4389_v23 = vld [vmem:[#allocation9 + $0x264] sm:$0xf]  ;;  %v3589_v29 = vor.u32 %v4325_v18, %v3586_v19  ;;  %v3784_v0 = vld [vmem:[#allocation9 + $0x1e8] sm:$0xf]  ;;  %v3657_v14 = vor.u32 %v4344_v63, %v3656_v62 }
 0x195   : > { %2349 = vmatpush.bf16.msrb.mxu0 %v3621_v48  ;;  %v3842_v24 = vld [vmem:[#allocation9 + $0x270] sm:$0xf0]  ;;  %2341 = vmatmul.bf16.vlgmr.msra.gmra.mxu3 %v5377_v11  ;;  %v4421_v26 = vld [vmem:[#allocation9 + $0x364] sm:$0xf]  ;;  %v3717_v30 = vor.u32 %v4357_v20, %v3714_v22  ;;  %v4376_v2 = vld [vmem:[#allocation9 + $0x1f4] sm:$0xf0] }
 0x196   : > { %2363 = vmatpush.bf16.msrb.mxu1 %v3749_v49  ;;  %v3970_v28 = vld [vmem:[#allocation9 + $0x370] sm:$0xf0]  ;;  %v3845_v31 = vor.u32 %v4389_v23, %v3842_v24  ;;  %v4321_v32 = vld [vmem:[#allocation9 + $0x44] sm:$0xf]  ;;  %v3912_v3 = vld [vmem:[#allocation9 + $0x2e8] sm:$0xf] }
 0x197   : > { %2377 = vmatpush.bf16.msrb.mxu2 %v3877_v59  ;;  %2313 = vmatmul.bf16.vlgmr.msra.gmra.mxu1 %v5381_v25  ;;  %v3570_v33 = vld [vmem:[#allocation9 + $0x50] sm:$0xf0]  ;;  %v4353_v35 = vld [vmem:[#allocation9 + $0x144] sm:$0xf]  ;;  %v3973_v36 = vor.u32 %v4421_v26, %v3970_v28  ;;  %v4408_v6 = vld [vmem:[#allocation9 + $0x2f4] sm:$0xf0] }
 0x198   : > { %2391 = vmatpush.bf16.msrb.mxu3 %v4005_v60  ;;  %v3698_v37 = vld [vmem:[#allocation9 + $0x150] sm:$0xf0]  ;;  %v4385_v38 = vld [vmem:[#allocation9 + $0x244] sm:$0xf]  ;;  %v3573_v41 = vor.u32 %v4321_v32, %v3570_v33  ;;  %v4040_v10 = vld [vmem:[#allocation9 + $0x3e8] sm:$0xf] }
 0x199   : > { %2350 = vmatpush.bf16.msrb.mxu0 %v3605_v12  ;;  %v3826_v39 = vld [vmem:[#allocation9 + $0x250] sm:$0xf0]  ;;  %v4417_v40 = vld [vmem:[#allocation9 + $0x344] sm:$0xf]  ;;  %v3701_v34 = vor.u32 %v4353_v35, %v3698_v37  ;;  %v4440_v12 = vld [vmem:[#allocation9 + $0x3f4] sm:$0xf0] }
 0x19a   : > { %2364 = vmatpush.bf16.msrb.mxu1 %v3733_v15  ;;  %v3954_v27 = vld [vmem:[#allocation9 + $0x350] sm:$0xf0]  ;;  %v3829_v42 = vor.u32 %v4385_v38, %v3826_v39  ;;  %v4317_v9 = vld [vmem:[#allocation9 + $0x24] sm:$0xf]  ;;  %v3785_v15 = vor.u32 %v4376_v2, %v3784_v0  ;;  %v3640_v18 = vld [vmem:[#allocation9 + $0xc8] sm:$0xf] }
 0x19b   : > { %2378 = vmatpush.bf16.msrb.mxu2 %v3861_v17  ;;  %v3554_v43 = vld [vmem:[#allocation9 + $0x30] sm:$0xf0]  ;;  %v4349_v16 = vld [vmem:[#allocation9 + $0x124] sm:$0xf]  ;;  %v3957_v44 = vor.u32 %v4417_v40, %v3954_v27  ;;  %v3913_v17 = vor.u32 %v4408_v6, %v3912_v3  ;;  %v4340_v19 = vld [vmem:[#allocation9 + $0xd4] sm:$0xf0] }
 0x19c   : > { %2392 = vmatpush.bf16.msrb.mxu3 %v3989_v21  ;;  %v3682_v45 = vld [vmem:[#allocation9 + $0x130] sm:$0xf0]  ;;  %v4381_v46 = vld [vmem:[#allocation9 + $0x224] sm:$0xf]  ;;  %v3557_v50 = vor.u32 %v4317_v9, %v3554_v43  ;;  %v3768_v20 = vld [vmem:[#allocation9 + $0x1c8] sm:$0xf]  ;;  %v4041_v21 = vor.u32 %v4440_v12, %v4040_v10 }
 0x19d   : > { %2351 = vmatpush.bf16.msrb.mxu0 %v3589_v29  ;;  %v3810_v47 = vld [vmem:[#allocation9 + $0x230] sm:$0xf0]  ;;  %v4413_v48 = vld [vmem:[#allocation9 + $0x324] sm:$0xf]  ;;  %v3685_v53 = vor.u32 %v4349_v16, %v3682_v45  ;;  %v4372_v22 = vld [vmem:[#allocation9 + $0x1d4] sm:$0xf0]  ;;  %v3641_v29 = vor.u32 %v4340_v19, %v3640_v18 }
 0x19e   : > { %2365 = vmatpush.bf16.msrb.mxu1 %v3717_v30  ;;  %v3938_v49 = vld [vmem:[#allocation9 + $0x330] sm:$0xf0]  ;;  %v4313_v51 = vld [vmem:[#allocation9 + $0x4] sm:$0xf]  ;;  %v3813_v54 = vor.u32 %v4381_v46, %v3810_v47  ;;  %v3896_v23 = vld [vmem:[#allocation9 + $0x2c8] sm:$0xf]  ;;  %v3769_v30 = vor.u32 %v4372_v22, %v3768_v20 }
 0x19f   : > { %2379 = vmatpush.bf16.msrb.mxu2 %v3845_v31  ;;  %v3538_v52 = vld [vmem:[#allocation9 + $0x10] sm:$0xf0]  ;;  %v4345_v55 = vld [vmem:[#allocation9 + $0x104] sm:$0xf]  ;;  %v3941_v58 = vor.u32 %v4413_v48, %v3938_v49  ;;  %v4404_v24 = vld [vmem:[#allocation9 + $0x2d4] sm:$0xf0] }
 0x1a0   : > { %2393 = vmatpush.bf16.msrb.mxu3 %v3973_v36  ;;  %v3666_v56 = vld [vmem:[#allocation9 + $0x110] sm:$0xf0]  ;;  %v4377_v57 = vld [vmem:[#allocation9 + $0x204] sm:$0xf]  ;;  %v3541_v1 = vor.u32 %v4313_v51, %v3538_v52  ;;  %v4024_v26 = vld [vmem:[#allocation9 + $0x3c8] sm:$0xf]  ;;  %v3897_v31 = vor.u32 %v4404_v24, %v3896_v23 }
 0x1a1   : > { %2352 = vmatpush.bf16.msrb.mxu0 %v3573_v41  ;;  %v3794_v59 = vld [vmem:[#allocation9 + $0x210] sm:$0xf0]  ;;  %v4409_v60 = vld [vmem:[#allocation9 + $0x304] sm:$0xf]  ;;  %v3669_v7 = vor.u32 %v4345_v55, %v3666_v56  ;;  %v4436_v28 = vld [vmem:[#allocation9 + $0x3d4] sm:$0xf0] }
 0x1a2   : > { %2366 = vmatpush.bf16.msrb.mxu1 %v3701_v34  ;;  %v3922_v61 = vld [vmem:[#allocation9 + $0x310] sm:$0xf0]  ;;  %v3797_v8 = vor.u32 %v4377_v57, %v3794_v59  ;;  %v3624_v32 = vld [vmem:[#allocation9 + $0xa8] sm:$0xf]  ;;  %v4336_v33 = vld [vmem:[#allocation9 + $0xb4] sm:$0xf0]  ;;  %v4025_v36 = vor.u32 %v4436_v28, %v4024_v26 }
 0x1a3   : > { %2380 = vmatpush.bf16.msrb.mxu2 %v3829_v42  ;;  %v3925_v13 = vor.u32 %v4409_v60, %v3922_v61  ;;  %v3752_v35 = vld [vmem:[#allocation9 + $0x1a8] sm:$0xf]  ;;  %v4368_v37 = vld [vmem:[#allocation9 + $0x1b4] sm:$0xf0]  ;;  %v3625_v41 = vor.u32 %v4336_v33, %v3624_v32 }
 0x1a4   : > { %2394 = vmatpush.bf16.msrb.mxu3 %v3957_v44  ;;  %v3880_v38 = vld [vmem:[#allocation9 + $0x2a8] sm:$0xf]  ;;  %v4400_v39 = vld [vmem:[#allocation9 + $0x2b4] sm:$0xf0]  ;;  %v3753_v34 = vor.u32 %v4368_v37, %v3752_v35 }
 0x1a5   : > { %2353 = vmatpush.bf16.msrb.mxu0 %v3557_v50  ;;  %v4008_v40 = vld [vmem:[#allocation9 + $0x3a8] sm:$0xf]  ;;  %v4432_v27 = vld [vmem:[#allocation9 + $0x3b4] sm:$0xf0]  ;;  %v3881_v42 = vor.u32 %v4400_v39, %v3880_v38 }
 0x1a6   : > { %2367 = vmatpush.bf16.msrb.mxu1 %v3685_v53  ;;  %v3608_v9 = vld [vmem:[#allocation9 + $0x88] sm:$0xf]  ;;  %v4332_v43 = vld [vmem:[#allocation9 + $0x94] sm:$0xf0]  ;;  %v4009_v44 = vor.u32 %v4432_v27, %v4008_v40 }
 0x1a7   : > { %2381 = vmatpush.bf16.msrb.mxu2 %v3813_v54  ;;  %v3736_v16 = vld [vmem:[#allocation9 + $0x188] sm:$0xf]  ;;  %v4364_v45 = vld [vmem:[#allocation9 + $0x194] sm:$0xf0]  ;;  %v3609_v50 = vor.u32 %v4332_v43, %v3608_v9  ;;  %v3786_v43 = vld [vmem:[#allocation9 + $0x1f8] sm:$0xf0] }
 0x1a8   : > { %2395 = vmatpush.bf16.msrb.mxu3 %v3941_v58  ;;  %v3864_v46 = vld [vmem:[#allocation9 + $0x288] sm:$0xf]  ;;  %v4396_v47 = vld [vmem:[#allocation9 + $0x294] sm:$0xf0]  ;;  %v3737_v51 = vor.u32 %v4364_v45, %v3736_v16  ;;  %v4406_v16 = vld [vmem:[#allocation9 + $0x2ec] sm:$0xf] }
 0x1a9   : > { %2354 = vmatpush.bf16.msrb.mxu0 %v3541_v1  ;;  %v3992_v48 = vld [vmem:[#allocation9 + $0x388] sm:$0xf]  ;;  %v4428_v49 = vld [vmem:[#allocation9 + $0x394] sm:$0xf0]  ;;  %v3865_v52 = vor.u32 %v4396_v47, %v3864_v46  ;;  %v4438_v47 = vld [vmem:[#allocation9 + $0x3ec] sm:$0xf] }
 0x1aa   : > { %2368 = vmatpush.bf16.msrb.mxu1 %v3669_v7  ;;  %v3592_v53 = vld [vmem:[#allocation9 + $0x68] sm:$0xf]  ;;  %v4328_v54 = vld [vmem:[#allocation9 + $0x74] sm:$0xf0]  ;;  %v3993_v56 = vor.u32 %v4428_v49, %v3992_v48  ;;  %v4042_v48 = vld [vmem:[#allocation9 + $0x3f8] sm:$0xf0] }
 0x1ab   : > { %2382 = vmatpush.bf16.msrb.mxu2 %v3797_v8  ;;  %v3720_v55 = vld [vmem:[#allocation9 + $0x168] sm:$0xf]  ;;  %v4360_v57 = vld [vmem:[#allocation9 + $0x174] sm:$0xf0]  ;;  %v3593_v62 = vor.u32 %v4328_v54, %v3592_v53  ;;  %v4338_v53 = vld [vmem:[#allocation9 + $0xcc] sm:$0xf] }
 0x1ac   : > { %2396 = vmatpush.bf16.msrb.mxu3 %v3925_v13  ;;  %2355 = vmatmul.bf16.vlgmr.msrb.gmra.mxu0 %v5375_v5  ;;  %v3848_v58 = vld [vmem:[#allocation9 + $0x268] sm:$0xf]  ;;  %v4392_v59 = vld [vmem:[#allocation9 + $0x274] sm:$0xf0]  ;;  %v3721_v63 = vor.u32 %v4360_v57, %v3720_v55  ;;  %v3642_v54 = vld [vmem:[#allocation9 + $0xd8] sm:$0xf0] }
 0x1ad   : > { %2403 = vmatpush.bf16.msra.mxu0 %v3657_v14  ;;  %2369 = vmatmul.bf16.vlgmr.msrb.gmra.mxu1 %v5381_v25  ;;  %v3976_v60 = vld [vmem:[#allocation9 + $0x368] sm:$0xf]  ;;  %v4424_v61 = vld [vmem:[#allocation9 + $0x374] sm:$0xf0]  ;;  %v3849_v0 = vor.u32 %v4392_v59, %v3848_v58  ;;  %v4370_v55 = vld [vmem:[#allocation9 + $0x1cc] sm:$0xf] }
 0x1ae   : > { %2417 = vmatpush.bf16.msra.mxu1 %v3785_v15  ;;  %2383 = vmatmul.bf16.vlgmr.msrb.gmra.mxu2 %v5373_v4  ;;  %v3576_v1 = vld [vmem:[#allocation9 + $0x48] sm:$0xf]  ;;  %v4324_v2 = vld [vmem:[#allocation9 + $0x54] sm:$0xf0]  ;;  %v3977_v6 = vor.u32 %v4424_v61, %v3976_v60  ;;  %v3770_v57 = vld [vmem:[#allocation9 + $0x1d8] sm:$0xf0] }
 0x1af   : > { %2431 = vmatpush.bf16.msra.mxu2 %v3913_v17  ;;  %2397 = vmatmul.bf16.vlgmr.msrb.gmra.mxu3 %v5377_v11  ;;  %v3704_v3 = vld [vmem:[#allocation9 + $0x148] sm:$0xf]  ;;  %v4356_v7 = vld [vmem:[#allocation9 + $0x154] sm:$0xf0]  ;;  %v3577_v14 = vor.u32 %v4324_v2, %v3576_v1  ;;  %v4402_v58 = vld [vmem:[#allocation9 + $0x2cc] sm:$0xf] }
 0x1b0   : > { %2445 = vmatpush.bf16.msra.mxu3 %v4041_v21  ;;  %v3832_v8 = vld [vmem:[#allocation9 + $0x248] sm:$0xf]  ;;  %v4388_v10 = vld [vmem:[#allocation9 + $0x254] sm:$0xf0]  ;;  %v3705_v15 = vor.u32 %v4356_v7, %v3704_v3  ;;  %v3898_v59 = vld [vmem:[#allocation9 + $0x2d8] sm:$0xf0] }
 0x1b1   : > { %2404 = vmatpush.bf16.msra.mxu0 %v3641_v29  ;;  %v3960_v12 = vld [vmem:[#allocation9 + $0x348] sm:$0xf]  ;;  %v4420_v13 = vld [vmem:[#allocation9 + $0x354] sm:$0xf0]  ;;  %v3833_v17 = vor.u32 %v4388_v10, %v3832_v8  ;;  %v4434_v60 = vld [vmem:[#allocation9 + $0x3cc] sm:$0xf] }
 0x1b2   : > { %2418 = vmatpush.bf16.msra.mxu1 %v3769_v30  ;;  %v3560_v18 = vld [vmem:[#allocation9 + $0x28] sm:$0xf]  ;;  %v4320_v19 = vld [vmem:[#allocation9 + $0x34] sm:$0xf0]  ;;  %v3961_v21 = vor.u32 %v4420_v13, %v3960_v12  ;;  %v4026_v61 = vld [vmem:[#allocation9 + $0x3d8] sm:$0xf0] }
 0x1b3   : > { %2432 = vmatpush.bf16.msra.mxu2 %v3897_v31  ;;  %v3688_v20 = vld [vmem:[#allocation9 + $0x128] sm:$0xf]  ;;  %v4352_v22 = vld [vmem:[#allocation9 + $0x134] sm:$0xf0]  ;;  %v3561_v29 = vor.u32 %v4320_v19, %v3560_v18  ;;  %v4334_v1 = vld [vmem:[#allocation9 + $0xac] sm:$0xf] }
 0x1b4   : > { %2446 = vmatpush.bf16.msra.mxu3 %v4025_v36  ;;  %v3816_v23 = vld [vmem:[#allocation9 + $0x228] sm:$0xf]  ;;  %v4384_v24 = vld [vmem:[#allocation9 + $0x234] sm:$0xf0]  ;;  %v3689_v33 = vor.u32 %v4352_v22, %v3688_v20  ;;  %v3626_v2 = vld [vmem:[#allocation9 + $0xb8] sm:$0xf0] }
 0x1b5   : > { %2405 = vmatpush.bf16.msra.mxu0 %v3625_v41  ;;  %v3944_v26 = vld [vmem:[#allocation9 + $0x328] sm:$0xf]  ;;  %v4416_v28 = vld [vmem:[#allocation9 + $0x334] sm:$0xf0]  ;;  %v3817_v35 = vor.u32 %v4384_v24, %v3816_v23  ;;  %v4342_v41 = vld [vmem:[#allocation9 + $0xec] sm:$0xf] }
 0x1b6   : > { %2419 = vmatpush.bf16.msra.mxu1 %v3753_v34  ;;  %v3544_v30 = vld [vmem:[#allocation9 + $0x8] sm:$0xf]  ;;  %v4316_v31 = vld [vmem:[#allocation9 + $0x14] sm:$0xf0]  ;;  %v3945_v39 = vor.u32 %v4416_v28, %v3944_v26  ;;  %v3658_v34 = vld [vmem:[#allocation9 + $0xf8] sm:$0xf0] }
 0x1b7   : > { %2433 = vmatpush.bf16.msra.mxu2 %v3881_v42  ;;  %v3672_v32 = vld [vmem:[#allocation9 + $0x108] sm:$0xf]  ;;  %v4348_v36 = vld [vmem:[#allocation9 + $0x114] sm:$0xf0]  ;;  %v4374_v42 = vld [vmem:[#allocation9 + $0x1ec] sm:$0xf]  ;;  %v3545_v9 = vor.u32 %v4316_v31, %v3544_v30 }
 0x1b8   : > { %2447 = vmatpush.bf16.msra.mxu3 %v4009_v44  ;;  %v3800_v37 = vld [vmem:[#allocation9 + $0x208] sm:$0xf]  ;;  %v4380_v38 = vld [vmem:[#allocation9 + $0x214] sm:$0xf0]  ;;  %v3914_v44 = vld [vmem:[#allocation9 + $0x2f8] sm:$0xf0]  ;;  %v3673_v45 = vor.u32 %v4348_v36, %v3672_v32 }
 0x1b9   : > { %2406 = vmatpush.bf16.msra.mxu0 %v3609_v50  ;;  %v3928_v40 = vld [vmem:[#allocation9 + $0x308] sm:$0xf]  ;;  %v4412_v27 = vld [vmem:[#allocation9 + $0x314] sm:$0xf0]  ;;  %v3801_v46 = vor.u32 %v4380_v38, %v3800_v37  ;;  %v3661_v50 = vor.u32 %v4342_v41, %v3658_v34  ;;  %v4366_v3 = vld [vmem:[#allocation9 + $0x1ac] sm:$0xf] }
 0x1ba   : > { %2420 = vmatpush.bf16.msra.mxu1 %v3737_v51  ;;  %v3929_v49 = vor.u32 %v4412_v27, %v3928_v40  ;;  %v3789_v51 = vor.u32 %v4374_v42, %v3786_v43  ;;  %v3754_v7 = vld [vmem:[#allocation9 + $0x1b8] sm:$0xf0]  ;;  %v4398_v8 = vld [vmem:[#allocation9 + $0x2ac] sm:$0xf] }
 0x1bb   : > { %2434 = vmatpush.bf16.msra.mxu2 %v3865_v52  ;;  %v3917_v52 = vor.u32 %v4406_v16, %v3914_v44  ;;  %v3882_v10 = vld [vmem:[#allocation9 + $0x2b8] sm:$0xf0]  ;;  %v4430_v12 = vld [vmem:[#allocation9 + $0x3ac] sm:$0xf] }
 0x1bc   : > { %2448 = vmatpush.bf16.msra.mxu3 %v3993_v56  ;;  %v4045_v56 = vor.u32 %v4438_v47, %v4042_v48  ;;  %v4010_v13 = vld [vmem:[#allocation9 + $0x3b8] sm:$0xf0]  ;;  %v4330_v18 = vld [vmem:[#allocation9 + $0x8c] sm:$0xf] }
 0x1bd   : > { %2407 = vmatpush.bf16.msra.mxu0 %v3593_v62  ;;  %v3645_v62 = vor.u32 %v4338_v53, %v3642_v54  ;;  %v3610_v19 = vld [vmem:[#allocation9 + $0x98] sm:$0xf0]  ;;  %v4362_v20 = vld [vmem:[#allocation9 + $0x18c] sm:$0xf] }
 0x1be   : > { %2421 = vmatpush.bf16.msra.mxu1 %v3721_v63  ;;  %v3773_v63 = vor.u32 %v4370_v55, %v3770_v57  ;;  %v3738_v22 = vld [vmem:[#allocation9 + $0x198] sm:$0xf0]  ;;  %v4394_v23 = vld [vmem:[#allocation9 + $0x28c] sm:$0xf] }
 0x1bf   : > { %2435 = vmatpush.bf16.msra.mxu2 %v3849_v0  ;;  %v3901_v0 = vor.u32 %v4402_v58, %v3898_v59  ;;  %v3866_v24 = vld [vmem:[#allocation9 + $0x298] sm:$0xf0]  ;;  %v4426_v26 = vld [vmem:[#allocation9 + $0x38c] sm:$0xf]  ;;  %v3741_v30 = vor.u32 %v4362_v20, %v3738_v22  ;;  %v4447_v20 = vld [vmem:[#allocation12 + $0x30] sm:$0xff] }
 0x1c0   : > { %2449 = vmatpush.bf16.msra.mxu3 %v3977_v6  ;;  %v4029_v6 = vor.u32 %v4434_v60, %v4026_v61  ;;  %v3994_v28 = vld [vmem:[#allocation9 + $0x398] sm:$0xf0]  ;;  %v3869_v31 = vor.u32 %v4394_v23, %v3866_v24  ;;  %v4326_v32 = vld [vmem:[#allocation9 + $0x6c] sm:$0xf]  ;;  %v4445_v22 = vld [vmem:[#allocation12 + $0x20] sm:$0xff] }
 0x1c1   : > { %2408 = vmatpush.bf16.msra.mxu0 %v3577_v14  ;;  %v3629_v14 = vor.u32 %v4334_v1, %v3626_v2  ;;  %v3997_v36 = vor.u32 %v4426_v26, %v3994_v28  ;;  %v3722_v37 = vld [vmem:[#allocation9 + $0x178] sm:$0xf0]  ;;  %v4390_v38 = vld [vmem:[#allocation9 + $0x26c] sm:$0xf]  ;;  %v4443_v26 = vld [vmem:[#allocation12 + $0x10] sm:$0xff] }
 0x1c2   : > { %2422 = vmatpush.bf16.msra.mxu1 %v3705_v15  ;;  %v3757_v15 = vor.u32 %v4366_v3, %v3754_v7  ;;  %v4422_v40 = vld [vmem:[#allocation9 + $0x36c] sm:$0xf]  ;;  %v3978_v27 = vld [vmem:[#allocation9 + $0x378] sm:$0xf0]  ;;  %v4455_v28 = vld [vmem:[#allocation12 + $0x70] sm:$0xff] }
 0x1c3   : > { %2436 = vmatpush.bf16.msra.mxu2 %v3833_v17  ;;  %v3885_v17 = vor.u32 %v4398_v8, %v3882_v10  ;;  %v3578_v43 = vld [vmem:[#allocation9 + $0x58] sm:$0xf0]  ;;  %v4354_v16 = vld [vmem:[#allocation9 + $0x14c] sm:$0xf]  ;;  %v3981_v44 = vor.u32 %v4422_v40, %v3978_v27 }
 0x1c4   : > { %2450 = vmatpush.bf16.msra.mxu3 %v3961_v21  ;;  %v4013_v21 = vor.u32 %v4430_v12, %v4010_v13  ;;  %v3834_v47 = vld [vmem:[#allocation9 + $0x258] sm:$0xf0]  ;;  %v4418_v48 = vld [vmem:[#allocation9 + $0x34c] sm:$0xf] }
 0x1c5   : > { %2409 = vmatpush.bf16.msra.mxu0 %v3561_v29  ;;  %v3613_v29 = vor.u32 %v4330_v18, %v3610_v19  ;;  %v4318_v53 = vld [vmem:[#allocation9 + $0x2c] sm:$0xf]  ;;  %v3562_v54 = vld [vmem:[#allocation9 + $0x38] sm:$0xf0] }
 0x1c6   : > { %2423 = vmatpush.bf16.msra.mxu1 %v3689_v33  ;;  %v3594_v33 = vld [vmem:[#allocation9 + $0x78] sm:$0xf0]  ;;  %v4350_v55 = vld [vmem:[#allocation9 + $0x12c] sm:$0xf] }
 0x1c7   : > { %2437 = vmatpush.bf16.msra.mxu2 %v3817_v35  ;;  %v4358_v35 = vld [vmem:[#allocation9 + $0x16c] sm:$0xf]  ;;  %v3597_v41 = vor.u32 %v4326_v32, %v3594_v33  ;;  %v3690_v57 = vld [vmem:[#allocation9 + $0x138] sm:$0xf0] }
 0x1c8   : > { %2451 = vmatpush.bf16.msra.mxu3 %v3945_v39  ;;  %v3850_v39 = vld [vmem:[#allocation9 + $0x278] sm:$0xf0]  ;;  %v3725_v34 = vor.u32 %v4358_v35, %v3722_v37  ;;  %v4382_v58 = vld [vmem:[#allocation9 + $0x22c] sm:$0xf] }
 0x1c9   : > { %2410 = vmatpush.bf16.msra.mxu0 %v3545_v9  ;;  %v3853_v42 = vor.u32 %v4390_v38, %v3850_v39  ;;  %v4322_v9 = vld [vmem:[#allocation9 + $0x4c] sm:$0xf]  ;;  %v3818_v59 = vld [vmem:[#allocation9 + $0x238] sm:$0xf0] }
 0x1ca   : > { %2424 = vmatpush.bf16.msra.mxu1 %v3673_v45  ;;  %v3706_v45 = vld [vmem:[#allocation9 + $0x158] sm:$0xf0]  ;;  %v4414_v60 = vld [vmem:[#allocation9 + $0x32c] sm:$0xf] }
 0x1cb   : > { %2438 = vmatpush.bf16.msra.mxu2 %v3801_v46  ;;  %v4386_v46 = vld [vmem:[#allocation9 + $0x24c] sm:$0xf]  ;;  %v3946_v61 = vld [vmem:[#allocation9 + $0x338] sm:$0xf0] }
 0x1cc   : > { %2452 = vmatpush.bf16.msra.mxu3 %v3929_v49  ;;  %2411 = vmatmul.bf16.vlgmr.msra.gmra.mxu0 %v5375_v5  ;;  %v3962_v49 = vld [vmem:[#allocation9 + $0x358] sm:$0xf0]  ;;  %v4314_v1 = vld [vmem:[#allocation9 + $0xc] sm:$0xf] }
 0x1cd   : > { %2459 = vmatpush.bf16.msrb.mxu0 %v3661_v50  ;;  %2425 = vmatmul.bf16.vlgmr.msra.gmra.mxu1 %v5381_v25  ;;  %v3581_v50 = vor.u32 %v4322_v9, %v3578_v43  ;;  %v3546_v2 = vld [vmem:[#allocation9 + $0x18] sm:$0xf0]  ;;  %v4346_v3 = vld [vmem:[#allocation9 + $0x10c] sm:$0xf]  ;;  %v4449_v43 = vld [vmem:[#allocation12 + $0x40] sm:$0xff] }
 0x1ce   : > { %2473 = vmatpush.bf16.msrb.mxu1 %v3789_v51  ;;  %2439 = vmatmul.bf16.vlgmr.msra.gmra.mxu2 %v5373_v4  ;;  %v3709_v51 = vor.u32 %v4354_v16, %v3706_v45  ;;  %v3674_v7 = vld [vmem:[#allocation9 + $0x118] sm:$0xf0]  ;;  %v4378_v8 = vld [vmem:[#allocation9 + $0x20c] sm:$0xf] }
 0x1cf   : > { %2487 = vmatpush.bf16.msrb.mxu2 %v3917_v52  ;;  %2453 = vmatmul.bf16.vlgmr.msra.gmra.mxu3 %v5377_v11  ;;  %v3837_v52 = vor.u32 %v4386_v46, %v3834_v47  ;;  %v3802_v10 = vld [vmem:[#allocation9 + $0x218] sm:$0xf0]  ;;  %v4410_v12 = vld [vmem:[#allocation9 + $0x30c] sm:$0xf]  ;;  %v4463_v47 = vld [vmem:[#allocation12 + $0xb0] sm:$0xff] }
 0x1d0   : > { %2501 = vmatpush.bf16.msrb.mxu3 %v4045_v56  ;;  %v3965_v56 = vor.u32 %v4418_v48, %v3962_v49  ;;  %v3930_v13 = vld [vmem:[#allocation9 + $0x318] sm:$0xf0]  ;;  %v4450_v40 = vld [vmem:[#allocation12 + $0x48] sm:$0xff] }
 0x1d1   : > { %2460 = vmatpush.bf16.msrb.mxu0 %v3645_v62  ;;  %v3565_v62 = vor.u32 %v4318_v53, %v3562_v54  ;;  %v3933_v18 = vor.u32 %v4410_v12, %v3930_v13  ;;  %v4448_v19 = vld [vmem:[#allocation12 + $0x38] sm:$0xff] }
 0x1d2   : > { %2474 = vmatpush.bf16.msrb.mxu1 %v3773_v63  ;;  %v3693_v63 = vor.u32 %v4350_v55, %v3690_v57  ;;  %v4444_v23 = vld [vmem:[#allocation12 + $0x18] sm:$0xff] }
 0x1d3   : > { %2488 = vmatpush.bf16.msrb.mxu2 %v3901_v0  ;;  %v3821_v0 = vor.u32 %v4382_v58, %v3818_v59  ;;  %v4456_v24 = vld [vmem:[#allocation12 + $0x78] sm:$0xff]  ;;  %v4461_v58 = vld [vmem:[#allocation12 + $0xa0] sm:$0xff] }
 0x1d4   : > { %2502 = vmatpush.bf16.msrb.mxu3 %v4029_v6  ;;  %v3949_v6 = vor.u32 %v4414_v60, %v3946_v61  ;;  %v4464_v16 = vld [vmem:[#allocation12 + $0xb8] sm:$0xff] }
 0x1d5   : > { %2461 = vmatpush.bf16.msrb.mxu0 %v3629_v14  ;;  %v3549_v14 = vor.u32 %v4314_v1, %v3546_v2  ;;  %v4460_v61 = vld [vmem:[#allocation12 + $0x98] sm:$0xff] }
 0x1d6   : > { %2475 = vmatpush.bf16.msrb.mxu1 %v3757_v15  ;;  %v3677_v15 = vor.u32 %v4346_v3, %v3674_v7  ;;  %v4459_v3 = vld [vmem:[#allocation12 + $0x90] sm:$0xff] }
 0x1d7   : > { %2489 = vmatpush.bf16.msrb.mxu2 %v3885_v17  ;;  %v3805_v17 = vor.u32 %v4378_v8, %v3802_v10  ;;  %v4458_v10 = vld [vmem:[#allocation12 + $0x88] sm:$0xff] }
 0x1d8   : > { %2503 = vmatpush.bf16.msrb.mxu3 %v4013_v21  ;;  %v4446_v21 = vld [vmem:[#allocation12 + $0x28] sm:$0xff] }
 0x1d9   : > { %2462 = vmatpush.bf16.msrb.mxu0 %v3613_v29  ;;  %v4454_v29 = vld [vmem:[#allocation12 + $0x68] sm:$0xff] }
 0x1da   : > { %2476 = vmatpush.bf16.msrb.mxu1 %v3741_v30 }
 0x1db   : > { %2490 = vmatpush.bf16.msrb.mxu2 %v3869_v31  ;;  %v4452_v31 = vld [vmem:[#allocation12 + $0x58] sm:$0xff] }
 0x1dc   : > { %2504 = vmatpush.bf16.msrb.mxu3 %v3997_v36  ;;  %v4451_v36 = vld [vmem:[#allocation12 + $0x50] sm:$0xff] }
 0x1dd   : > { %2463 = vmatpush.bf16.msrb.mxu0 %v3597_v41 }
 0x1de   : > { %2477 = vmatpush.bf16.msrb.mxu1 %v3725_v34 }
 0x1df   : > { %2491 = vmatpush.bf16.msrb.mxu2 %v3853_v42 }
 0x1e0   : > { %2505 = vmatpush.bf16.msrb.mxu3 %v3981_v44 }
 0x1e1   : > { %2464 = vmatpush.bf16.msrb.mxu0 %v3581_v50 }
 0x1e2   : > { %2478 = vmatpush.bf16.msrb.mxu1 %v3709_v51  ;;  %v4462_v51 = vld [vmem:[#allocation12 + $0xa8] sm:$0xff] }
 0x1e3   : > { %2492 = vmatpush.bf16.msrb.mxu2 %v3837_v52 }
 0x1e4   : > { %2506 = vmatpush.bf16.msrb.mxu3 %v3965_v56 }
 0x1e5   : > { %2465 = vmatpush.bf16.msrb.mxu0 %v3565_v62 }
 0x1e6   : > { %2479 = vmatpush.bf16.msrb.mxu1 %v3693_v63 }
 0x1e7   : > { %2493 = vmatpush.bf16.msrb.mxu2 %v3821_v0 }
 0x1e8   : > { %2507 = vmatpush.bf16.msrb.mxu3 %v3949_v6 }
 0x1e9   : > { %2466 = vmatpush.bf16.msrb.mxu0 %v3549_v14 }
 0x1ea   : > { %2480 = vmatpush.bf16.msrb.mxu1 %v3677_v15 }
 0x1eb   : > { %2494 = vmatpush.bf16.msrb.mxu2 %v3805_v17  ;;  %v4457_v17 = vld [vmem:[#allocation12 + $0x80] sm:$0xff] }
 0x1ec   : > { %2508 = vmatpush.bf16.msrb.mxu3 %v3933_v18  ;;  %2467 = vmatmul.bf16.vlgmr.msrb.gmra.mxu0 %v5375_v5  ;;  %v4442_v5 = vld [vmem:[#allocation12 + $0x8] sm:$0xff] }
 0x1ed   : > { %2786 = vmatpush.bf16.msra.mxu0 %v4448_v19  ;;  %2481 = vmatmul.bf16.vlgmr.msrb.gmra.mxu1 %v5381_v25  ;;  %v5397_v25 = vld [vmem:[#allocation11] sm:$0xf] }
 0x1ee   : > { %2495 = vmatmul.bf16.vlgmr.msrb.gmra.mxu2 %v5373_v4  ;;  %2800 = vmatpush.bf16.msra.mxu1 %v4456_v24  ;;  %v4441_v4 = vld [vmem:[#allocation12] sm:$0xff]  ;;  %v1643_v30 = vperm.slane %v5397_v25, 0  ;;  %v1644_v54 = vperm.slane %v5397_v25, 1  ;;  %v4472_v19 = vld [vmem:[#allocation12 + $0xf8] sm:$0xff] }
 0x1ef   : > { %2509 = vmatmul.bf16.vlgmr.msrb.gmra.mxu3 %v5377_v11  ;;  %v4453_v11 = vld [vmem:[#allocation12 + $0x60] sm:$0xff]  ;;  %2814 = vmatpush.bf16.msra.mxu2 %v4464_v16 }
 0x1f0   : > { %2828 = vmatpush.bf16.msra.mxu3 %v4472_v19  ;;  %v4469_v24 = vld [vmem:[#allocation12 + $0xe0] sm:$0xff] }
 0x1f1   : > { %2787 = vmatpush.bf16.msra.mxu0 %v4447_v20 }
 0x1f2   : > { %2801 = vmatpush.bf16.msra.mxu1 %v4455_v28 }
 0x1f3   : > { %2815 = vmatpush.bf16.msra.mxu2 %v4463_v47 }
 0x1f5   : > { %2788 = vmatpush.bf16.msra.mxu0 %v4446_v21  ;;  %v4471_v21 = vld [vmem:[#allocation12 + $0xf0] sm:$0xff] }
 0x1f6   : > { %2802 = vmatpush.bf16.msra.mxu1 %v4454_v29  ;;  %2829 = vmatpush.bf16.msra.mxu3 %v4471_v21 }
 0x1f7   : > { %2816 = vmatpush.bf16.msra.mxu2 %v4462_v51 }
 0x1f9   : > { %2789 = vmatpush.bf16.msra.mxu0 %v4445_v22  ;;  %v4470_v22 = vld [vmem:[#allocation12 + $0xe8] sm:$0xff] }
 0x1fa   : > { %2803 = vmatpush.bf16.msra.mxu1 %v4453_v11  ;;  %2830 = vmatpush.bf16.msra.mxu3 %v4470_v22 }
 0x1fb   : > { %2817 = vmatpush.bf16.msra.mxu2 %v4461_v58 }
 0x1fd   : > { %2790 = vmatpush.bf16.msra.mxu0 %v4444_v23  ;;  %v1645_v23 = vperm.slane %v5397_v25, 2 }
 0x1fe   : > { %2804 = vmatpush.bf16.msra.mxu1 %v4452_v31  ;;  %2831 = vmatpush.bf16.msra.mxu3 %v4469_v24 }
 0x1ff   : > { %2818 = vmatpush.bf16.msra.mxu2 %v4460_v61 }
 0x201   : > { %2791 = vmatpush.bf16.msra.mxu0 %v4443_v26 }
 0x202   : > { %2805 = vmatpush.bf16.msra.mxu1 %v4451_v36 }
 0x203   : > { %2819 = vmatpush.bf16.msra.mxu2 %v4459_v3 }
 0x205   : > { %2792 = vmatpush.bf16.msra.mxu0 %v4442_v5 }
 0x206   : > { %2806 = vmatpush.bf16.msra.mxu1 %v4450_v40 }
 0x207   : > { %2820 = vmatpush.bf16.msra.mxu2 %v4458_v10 }
 0x209   : > { %2793 = vmatpush.bf16.msra.mxu0 %v4441_v4  ;;  %v4468_v4 = vld [vmem:[#allocation12 + $0xd8] sm:$0xff] }
 0x20a   : > { %2807 = vmatpush.bf16.msra.mxu1 %v4449_v43  ;;  %2832 = vmatpush.bf16.msra.mxu3 %v4468_v4 }
 0x20b   : > { %2821 = vmatpush.bf16.msra.mxu2 %v4457_v17 }
 0x210   : > { %v2300_v32 = vpop.f32.mrf.mxu0 }
 0x211   : > { %v2301_v33 = vadd.f32 %v2300_v32, %v1643_v30 }
 0x214   : > { %v2314_v35 = vpop.f32.mrf.mxu1 }
 0x215   : > { %v2315_v37 = vadd.f32 %v2314_v35, %v2301_v33  ;;  %v2328_v38 = vpop.f32.mrf.mxu2  ;;  %v4467_v33 = vld [vmem:[#allocation12 + $0xd0] sm:$0xff] }
 0x216   : > { %2833 = vmatpush.bf16.msra.mxu3 %v4467_v33 }
 0x217   : > { %v2329_v27 = vadd.f32 %v2328_v38, %v2315_v37 }
 0x218   : > { %v2342_v39 = vpop.f32.mrf.mxu3  ;;  %v2302_v41 = vpop.f32.mrf.mxu0 }
 0x219   : > { %v2303_v34 = vadd.f32 %v2302_v41, %v1643_v30  ;;  %v2343_v44 = vadd.f32 %v2342_v39, %v2329_v27  ;;  %v4466_v39 = vld [vmem:[#allocation12 + $0xc8] sm:$0xff] }
 0x21a   : > { %2834 = vmatpush.bf16.msra.mxu3 %v4466_v39 }
 0x21b   : > { %v2515_v49 = vmax.f32 %v2343_v44, 0.0  ;;  %v1646_v44 = vperm.slane %v5397_v25, 3 }
 0x21c   : > { %v2316_v42 = vpop.f32.mrf.mxu1 }
 0x21d   : > { %v2317_v9 = vadd.f32 %v2316_v42, %v2303_v34  ;;  %v2330_v45 = vpop.f32.mrf.mxu2 }
 0x21f   : > { %v2331_v46 = vadd.f32 %v2330_v45, %v2317_v9  ;;  %v4465_v9 = vld [vmem:[#allocation12 + $0xc0] sm:$0xff] }
 0x220   : > { %v2344_v48 = vpop.f32.mrf.mxu3  ;;  %2835 = vmatpush.bf16.msra.mxu3 %v4465_v9 }
 0x221   : > { %v2345_v50 = vadd.f32 %v2344_v48, %v2331_v46 }
 0x223   : > { %v2519_v52 = vmax.f32 %v2345_v50, 0.0 }
 0x225   : > { %v2523_v53 = vpack.c.bf16 %v2519_v52, %v2515_v49 }
 0x227   : > { %2794 = vmatmul.bf16.vlgmr.msra.gmra.mxu0 %v2523_v53 }
 0x229   : > { %v2356_v55 = vpop.f32.mrf.mxu0 }
 0x22a   : > { %v2357_v56 = vadd.f32 %v2356_v55, %v1644_v54  ;;  %v2370_v57 = vpop.f32.mrf.mxu1 }
 0x22c   : > { %v2371_v59 = vadd.f32 %v2370_v57, %v2357_v56 }
 0x231   : > { %v2384_v60 = vpop.f32.mrf.mxu2  ;;  %v2358_v0 = vpop.f32.mrf.mxu0 }
 0x232   : > { %v2398_v62 = vpop.f32.mrf.mxu3  ;;  %v2385_v63 = vadd.f32 %v2384_v60, %v2371_v59  ;;  %v2359_v1 = vadd.f32 %v2358_v0, %v1644_v54  ;;  %v2372_v2 = vpop.f32.mrf.mxu1  ;;  %v4589_v0 = vld [vmem:[%s5434_s6] ss:$0 sm:$0xff] }
 0x234   : > { %v2373_v6 = vadd.f32 %v2372_v2, %v2359_v1  ;;  %v2399_v7 = vadd.f32 %v2398_v62, %v2385_v63 }
 0x236   : > { %v2516_v14 = vmax.f32 %v2399_v7, 0.0 }
 0x239   : > { %v2386_v8 = vpop.f32.mrf.mxu2 }
 0x23a   : > { %v2387_v12 = vadd.f32 %v2386_v8, %v2373_v6  ;;  %v2400_v13 = vpop.f32.mrf.mxu3 }
 0x23c   : > { %v2401_v15 = vadd.f32 %v2400_v13, %v2387_v12 }
 0x23e   : > { %v2520_v18 = vmax.f32 %v2401_v15, 0.0 }
 0x240   : > { %v2524_v20 = vpack.c.bf16 %v2520_v18, %v2516_v14 }
 0x242   : > { %2808 = vmatmul.bf16.vlgmr.msra.gmra.mxu1 %v2524_v20 }
 0x249   : > { %v2412_v26 = vpop.f32.mrf.mxu0 }
 0x24a   : > { %v2413_v28 = vadd.f32 %v2412_v26, %v1645_v23  ;;  %v2426_v5 = vpop.f32.mrf.mxu1 }
 0x24c   : > { %v2427_v29 = vadd.f32 %v2426_v5, %v2413_v28 }
 0x251   : > { %v2440_v11 = vpop.f32.mrf.mxu2  ;;  %v2414_v32 = vpop.f32.mrf.mxu0 }
 0x252   : > { %v2454_v30 = vpop.f32.mrf.mxu3  ;;  %v2441_v31 = vadd.f32 %v2440_v11, %v2427_v29  ;;  %v2415_v35 = vadd.f32 %v2414_v32, %v1645_v23  ;;  %v2428_v36 = vpop.f32.mrf.mxu1 }
 0x254   : > { %v2429_v37 = vadd.f32 %v2428_v36, %v2415_v35  ;;  %v2455_v38 = vadd.f32 %v2454_v30, %v2441_v31 }
 0x256   : > { %v2517_v34 = vmax.f32 %v2455_v38, 0.0 }
 0x259   : > { %v2442_v40 = vpop.f32.mrf.mxu2 }
 0x25a   : > { %v2443_v27 = vadd.f32 %v2442_v40, %v2429_v37  ;;  %v2456_v41 = vpop.f32.mrf.mxu3 }
 0x25c   : > { %v2457_v42 = vadd.f32 %v2456_v41, %v2443_v27 }
 0x25e   : > { %v2521_v43 = vmax.f32 %v2457_v42, 0.0 }
 0x260   : > { %v2525_v16 = vpack.c.bf16 %v2521_v43, %v2517_v34 }
 0x262   : > { %2822 = vmatmul.bf16.vlgmr.msra.gmra.mxu2 %v2525_v16 }
 0x269   : > { %v2468_v45 = vpop.f32.mrf.mxu0 }
 0x26a   : > { %v2482_v46 = vpop.f32.mrf.mxu1  ;;  %v2469_v47 = vadd.f32 %v2468_v45, %v1646_v44 }
 0x26c   : > { %v2483_v49 = vadd.f32 %v2482_v46, %v2469_v47 }
 0x271   : > { %v2496_v48 = vpop.f32.mrf.mxu2  ;;  %v2470_v51 = vpop.f32.mrf.mxu0 }
 0x272   : > { %v2510_v50 = vpop.f32.mrf.mxu3  ;;  %v2471_v52 = vadd.f32 %v2470_v51, %v1646_v44  ;;  %v2497_v53 = vadd.f32 %v2496_v48, %v2483_v49  ;;  %v2484_v54 = vpop.f32.mrf.mxu1 }
 0x274   : > { %v2485_v55 = vadd.f32 %v2484_v54, %v2471_v52  ;;  %v2511_v57 = vadd.f32 %v2510_v50, %v2497_v53 }
 0x276   : > { %v2518_v61 = vmax.f32 %v2511_v57, 0.0 }
 0x279   : > { %v2498_v56 = vpop.f32.mrf.mxu2 }
 0x27a   : > { %v2499_v58 = vadd.f32 %v2498_v56, %v2485_v55  ;;  %v2512_v59 = vpop.f32.mrf.mxu3 }
 0x27c   : > { %v2513_v60 = vadd.f32 %v2512_v59, %v2499_v58 }
 0x27e   : > { %v2522_v62 = vmax.f32 %v2513_v60, 0.0 }
 0x280   : > { %v2526_v63 = vpack.c.bf16 %v2522_v62, %v2518_v61 }
 0x282   : > { %2836 = vmatmul.bf16.vlgmr.msra.gmra.mxu3 %v2526_v63 }
 0x2a4   : > { %v2795_v25 = vpop.f32.mrf.mxu0 }
 0x2a5   : > { %v2796_v3 = vadd.f32 %v4589_v0, %v2795_v25 }
 0x2ac   : > { %v2797_v8 = vpop.f32.mrf.mxu0 }
 0x2ad   : > { %v2798_v14 = vadd.f32 %v4589_v0, %v2797_v8 }
 0x2bf   : > { %v2809_v1 = vpop.f32.mrf.mxu1 }
 0x2c0   : > { %v2810_v6 = vadd.f32 %v2809_v1, %v2796_v3 }
 0x2c7   : > { %v2811_v13 = vpop.f32.mrf.mxu1 }
 0x2c8   : > { %v2812_v17 = vadd.f32 %v2811_v13, %v2798_v14 }
 0x2e5   : > { %v2823_v2 = vpop.f32.mrf.mxu2 }
 0x2e6   : > { %v2824_v7 = vadd.f32 %v2823_v2, %v2810_v6 }
 0x2ed   : > { %v2825_v15 = vpop.f32.mrf.mxu2 }
 0x2ee   : > { %v2826_v18 = vadd.f32 %v2825_v15, %v2812_v17 }
 0x305   : > { %v2837_v10 = vpop.f32.mrf.mxu3 }
 0x306   : > { %v2838_v12 = vadd.f32 %v2837_v10, %v2824_v7 }
 0x308   : > { %2842 = vst [vmem:[#allocation14] sm:$0xff] %v2838_v12 }
 0x30d   : > { %v2839_v19 = vpop.f32.mrf.mxu3 }
 0x30e   : > { %v2840_v20 = vadd.f32 %v2839_v19, %v2826_v18 }
 0x310   : > { %2843 = vst [vmem:[#allocation14 + $0x8] sm:$0xff] %v2840_v20 }
 0x311 PF: > { %p4526_p3 = scmp.eq.s32.totalorder %s4952_s30, 1  ;;  %s2854_s11 = sshll.u32 %s5435_s7, 4  ;;  %s2855_s11 = int_to_ptr.hbm [resolvable:$true] %s2854_s11 }
 0x312   : > { %s4880_s24 = smov [#allocation14]   ;;  %s4881_s18 = smov 128  }
 0x313   : > { %s2852_s15 = sshll.u32 %s4880_s24, 4  ;;  %s4882_s13 = smov 8   ;;  %s2853_s15 = int_to_ptr.vmem [resolvable:$true] %s2852_s15 }
 0x314   : > { %4494 = dma.vmem_to_hbm [thread:$0]  (%p4526_p3), %s2853_s15, 256, %s2855_s11, [#allocation5], %s4881_s18, %s4881_s18, %s4882_s13  }
 0x315   : > { %4843 = dma.done.wait (%p4526_p3), [#allocation5], 256  }
 0x316   : > { %4845 = vsyncadd (%p4526_p3), [#allocation5], 4294967040 }
 0x317 PF: > { %s26_s29 = sadd.s32 1, %s4868_s29   ;;  %s5457_s24 = smov %s4852_s25 }
 0x318   : > { %p23_p4 = scmp.ge.s32.totalorder %s26_s29, 4   ;;  %s5458_s25 = smov %s4856_s26 }
 0x319   : > { %s5459_s26 = smov %s5016_s14  ;;  %s5460_s27 = smov %s4864_s28 }
 0x31a   : > { %s5461_s28 = smov %s5463_s23  ;;  %25 = sbr.rel (!%p23_p4) target bundleno = 15 (0xf), region = 123 }
 0x31f   :  { %2871 = vsyncpa [#allocation4], 1 }
 0x320   :  { %2873 = vsyncpa [#allocation4 + $0x1], 1 }
 0x321   :  { %2874 = vsyncpa [#allocation7], 1 }
 0x322   :  { %2876 = vsyncpa [#allocation7 + $0x1], 1 }
 0x323   :  { %2877 = vsyncpa [#allocation10], 1 }
 0x324   :  { %2878 = vsyncpa [#allocation13], 1 }
 0x325   :  { %2879 = vsyncpa [#allocation5], 1 }
 0x326   :  { %2881 = vsyncpa [#allocation5 + $0x1], 1 }

</bundles_post_ra>
